<compile_context>
chip_gen: v7x
topology: tpu7x:2x2x1
jax: 0.10.0
libtpu: 0.0.40
codegen_flags: <defaults>
</compile_context>

<pallas_src>
import math
from functools import partial

import jax
import jax.numpy as jnp
from jax.experimental import pallas as pl
from jax.experimental.pallas import tpu as pltpu

# pl.reciprocal(approx=True) (EUP vrcp) gives ~1e-3 rel-error in the softmax
# denominator; acceptable for inference. Set False for exact divide.
_SOFTMAX_APPROX_RECIP = True


def _query_vmem_cap():
    try:
        cap = int(pltpu.get_tpu_info().vmem_capacity_bytes)
        if cap <= 0:
            raise ValueError
        return cap
    except Exception:
        return 64 * 1024 * 1024  # conservative (v7x per-core) fallback


# leave ~16 MiB headroom for Mosaic internal scratch; cap at 112 MiB on 128 MiB chips
_VMEM_LIMIT = max(32 * 1024 * 1024,
                  min(_query_vmem_cap() - 16 * 1024 * 1024, 112 * 1024 * 1024))


def _cparams(*sem):
    return pltpu.CompilerParams(dimension_semantics=sem,
                                vmem_limit_bytes=_VMEM_LIMIT)


def _round_up(x, m):
    return ((x + m - 1) // m) * m


def _tile(dim, pref, align):
    """Largest `align`-multiple tile <= pref that evenly divides dim, else dim."""
    t = min(pref, dim)
    t -= t % align
    while t >= align:
        if dim % t == 0:
            return t
        t -= align
    return dim  # full-dim block (exempt from the (8,128) divisibility rule)


def _gelu_exact(x):
    # nn.GELU() default = exact erf-based GELU (f32)
    return 0.5 * x * (1.0 + jax.lax.erf(x * (1.0 / math.sqrt(2.0))))


def _layernorm_affine(x, g, b):
    # PyTorch LayerNorm: biased variance, eps=1e-5, computed in f32
    mu = jnp.mean(x, axis=-1, keepdims=True)
    var = jnp.mean((x - mu) ** 2, axis=-1, keepdims=True)
    return (x - mu) * jax.lax.rsqrt(var + 1e-5) * g + b


def _softmax_rows(s):
    m = jnp.max(s, axis=-1, keepdims=True)
    e = jnp.exp(s - m)
    denom = jnp.sum(e, axis=-1, keepdims=True)
    if _SOFTMAX_APPROX_RECIP:
        return e * pl.reciprocal(denom, approx=True)
    return e / denom


# ------------- fused attention block:  ln1(proj(attn(qkv(x))) + x) -----------

def _attn_block_kernel(x_ref, wqkv_ref, bqkv_ref, wo_ref, bo_ref, g_ref, beta_ref,
                       o_ref, *, n_head):
    x = x_ref[0]                                        # (T, D) f32 residual
    t, d = x.shape
    dh = d // n_head
    scale = 1.0 / math.sqrt(dh)

    # --- fused QKV projection (bf16 MXU operands, f32 accumulate) ---
    qkv = (jnp.dot(x.astype(jnp.bfloat16), wqkv_ref[...],
                   preferred_element_type=jnp.float32) + bqkv_ref[...])
    qkv = qkv.astype(jnp.bfloat16)                      # (T, 3D)

    # head-major views, leading head batch dim for batched dot_general
    q = jnp.transpose(qkv[:, 0 * d:1 * d].reshape(t, n_head, dh), (1, 0, 2))
    k = jnp.transpose(qkv[:, 1 * d:2 * d].reshape(t, n_head, dh), (1, 0, 2))
    v = jnp.transpose(qkv[:, 2 * d:3 * d].reshape(t, n_head, dh), (1, 0, 2))

    # scores (H, T, T) in f32
    s = jax.lax.dot_general(q, k, (((2,), (2,)), ((0,), (0,))),
                            preferred_element_type=jnp.float32) * scale
    qi = jax.lax.broadcasted_iota(jnp.int32, (t, t), 0)
    ki = jax.lax.broadcasted_iota(jnp.int32, (t, t), 1)
    s = jnp.where((ki <= qi)[None, :, :], s, jnp.float32(-1e30))

    p = _softmax_rows(s)                                # f32 softmax

    a = jax.lax.dot_general(p.astype(jnp.bfloat16), v,
                            (((2,), (1,)), ((0,), (0,))),
                            preferred_element_type=jnp.float32)   # (H, T, dh)
    a = jnp.transpose(a, (1, 0, 2)).reshape(t, d).astype(jnp.bfloat16)

    # out-projection + residual add + LayerNorm, lane-dense (T, D) store
    y = (jnp.dot(a, wo_ref[...], preferred_element_type=jnp.float32)
         + bo_ref[...] + x)
    o_ref[0] = _layernorm_affine(y, g_ref[...], beta_ref[...])


def attn_block(x, wqkv, bqkv, wo, bo, gamma, beta, *, n_head):
    bsz, t, d = x.shape
    kernel = partial(_attn_block_kernel, n_head=n_head)
    return pl.pallas_call(
        kernel,
        out_shape=jax.ShapeDtypeStruct((bsz, t, d), jnp.float32),
        grid=(bsz,),
        in_specs=[
            pl.BlockSpec((1, t, d), lambda i: (i, 0, 0)),
            pl.BlockSpec((d, 3 * d), lambda i: (0, 0)),
            pl.BlockSpec((1, 3 * d), lambda i: (0, 0)),
            pl.BlockSpec((d, d), lambda i: (0, 0)),
            pl.BlockSpec((1, d), lambda i: (0, 0)),
            pl.BlockSpec((1, d), lambda i: (0, 0)),
            pl.BlockSpec((1, d), lambda i: (0, 0)),
        ],
        out_specs=pl.BlockSpec((1, t, d), lambda i: (i, 0, 0)),
        compiler_params=_cparams("parallel"),
    )(x, wqkv, bqkv.reshape(1, 3 * d), wo, bo.reshape(1, d),
      gamma.reshape(1, d), beta.reshape(1, d))


# --------------- MLP fused with residual-add + LayerNorm (row-tiled) ---------

def _mlp_add_ln_kernel(x_ref, w1_ref, b1_ref, w2_ref, b2_ref, g_ref, beta_ref,
                       o_ref):
    x = x_ref[...]                                      # f32 (tm, D) residual
    h = jnp.dot(x.astype(jnp.bfloat16), w1_ref[...],
                preferred_element_type=jnp.float32) + b1_ref[...]
    h = _gelu_exact(h)                                  # f32
    y = jnp.dot(h.astype(jnp.bfloat16), w2_ref[...],
                preferred_element_type=jnp.float32) + b2_ref[...]
    o_ref[...] = _layernorm_affine(y + x, g_ref[...], beta_ref[...])


def mlp_add_ln(x, w1, b1, w2, b2, gamma, beta, *, tm=256):
    m, d = x.shape
    dh = w1.shape[1]
    tm = _tile(m, tm, 8)
    grid = (m // tm,)
    return pl.pallas_call(
        _mlp_add_ln_kernel,
        out_shape=jax.ShapeDtypeStruct((m, d), jnp.float32),
        grid=grid,
        in_specs=[
            pl.BlockSpec((tm, d), lambda i: (i, 0)),
            pl.BlockSpec((d, dh), lambda i: (0, 0)),
            pl.BlockSpec((1, dh), lambda i: (0, 0)),
            pl.BlockSpec((dh, d), lambda i: (0, 0)),
            pl.BlockSpec((1, d), lambda i: (0, 0)),
            pl.BlockSpec((1, d), lambda i: (0, 0)),
            pl.BlockSpec((1, d), lambda i: (0, 0)),
        ],
        out_specs=pl.BlockSpec((tm, d), lambda i: (i, 0)),
        compiler_params=_cparams("parallel"),
    )(x, w1, b1.reshape(1, dh), w2, b2.reshape(1, d),
      gamma.reshape(1, d), beta.reshape(1, d))


# ---------------- tied-weight head: logits = x @ emb^T (no bias) -------------

def _head_kernel(x_ref, e_ref, o_ref):
    # both operands pre-cast to bf16 in the wrapper; K (=D) not tiled,
    # result written straight to the f32 output tile (no acc scratch).
    o_ref[...] = jax.lax.dot_general(
        x_ref[...], e_ref[...], (((1,), (1,)), ((), ())),
        preferred_element_type=jnp.float32)


def tied_head(x_bf16, emb_bf16, *, tm=512, tv=512):
    m, d = x_bf16.shape
    v = emb_bf16.shape[0]
    tv = min(tv, _round_up(v, 128))          # lane-dense V tile
    vp = _round_up(v, tv)                    # pad vocab instead of full-dim fallback
    if vp != v:
        emb_bf16 = jnp.pad(emb_bf16, ((0, vp - v), (0, 0)))
    tm = _tile(m, tm, 8)                     # large tm -> emb streamed fewer times
    grid = (m // tm, vp // tv)
    out = pl.pallas_call(
        _head_kernel,
        out_shape=jax.ShapeDtypeStruct((m, vp), jnp.float32),
        grid=grid,
        in_specs=[
            pl.BlockSpec((tm, d), lambda i, j: (i, 0)),
            pl.BlockSpec((tv, d), lambda i, j: (j, 0)),
        ],
        out_specs=pl.BlockSpec((tm, tv), lambda i, j: (i, j)),
        compiler_params=_cparams("parallel", "parallel"),
    )(x_bf16, emb_bf16)
    return out[:, :v] if vp != v else out


# ------------------------------ model (glue) -------------------------------

def init_params(key, cfg):
    d, v, c, nl = cfg["n_embd"], cfg["vocab_size"], cfg["context_size"], cfg["n_layer"]

    def normal(k, shape, std=0.02, dtype=jnp.float32):
        return (std * jax.random.normal(k, shape, dtype=jnp.float32)).astype(dtype)

    keys = iter(jax.random.split(key, 2 + nl * 4))
    params = {
        # tok_emb kept f32 for the gather; tied head uses a bf16 cast of it
        "tok_emb": normal(next(keys), (v, d)),
        "pos_emb": normal(next(keys), (1, c, d)),
        "blocks": [],
    }
    for _ in range(nl):
        params["blocks"].append({
            # weights stored bf16 (MXU operands); biases / LN params stay f32
            "wqkv": normal(next(keys), (d, 3 * d), dtype=jnp.bfloat16),
            "bqkv": jnp.zeros((3 * d,), jnp.float32),
            "wo": normal(next(keys), (d, d), dtype=jnp.bfloat16),
            "bo": jnp.zeros((d,), jnp.float32),
            "ln1_g": jnp.ones((d,), jnp.float32), "ln1_b": jnp.zeros((d,), jnp.float32),
            "w1": normal(next(keys), (d, 4 * d), dtype=jnp.bfloat16),
            "b1": jnp.zeros((4 * d,), jnp.float32),
            "w2": normal(next(keys), (4 * d, d), dtype=jnp.bfloat16),
            "b2": jnp.zeros((d,), jnp.float32),
            "ln2_g": jnp.ones((d,), jnp.float32), "ln2_b": jnp.zeros((d,), jnp.float32),
        })
    return params


def gpt1_forward(idx, params, cfg):
    b, t = idx.shape
    d, h, v = cfg["n_embd"], cfg["n_head"], cfg["vocab_size"]
    n = b * t

    # embedding gather + positional add: JAX glue; dropout = identity (eval)
    x = jnp.take(params["tok_emb"], idx, axis=0) + params["pos_emb"][:, :t, :]
    # x: (B, T, D) f32 residual stream

    for blk in params["blocks"]:
        # x = ln1(attn_proj(attn(qkv(x))) + x)   -- one fused pallas_call
        x = attn_block(x, blk["wqkv"], blk["bqkv"], blk["wo"], blk["bo"],
                       blk["ln1_g"], blk["ln1_b"], n_head=h)
        # x = ln2(mlp(x) + x)                    -- one fused pallas_call
        x = mlp_add_ln(x.reshape(n, d), blk["w1"], blk["b1"], blk["w2"],
                       blk["b2"], blk["ln2_g"], blk["ln2_b"]).reshape(b, t, d)

    # tied-weight head: bf16 pre-cast operands, vocab padded lane-dense in wrapper
    emb_b = params["tok_emb"].astype(jnp.bfloat16)
    logits = tied_head(x.reshape(n, d).astype(jnp.bfloat16), emb_b)
    return logits.reshape(b, t, v)


# ---------------------------------- main -----------------------------------

if __name__ == "__main__":
    cfg = dict(vocab_size=256, n_embd=128, context_size=16, n_layer=2, n_head=4)
    B, T = 2, 16

    key = jax.random.PRNGKey(0)
    k_params, k_idx = jax.random.split(key)
    params = init_params(k_params, cfg)
    idx = jax.random.randint(k_idx, (B, T), 0, cfg["vocab_size"], dtype=jnp.int32)

    fwd = jax.jit(partial(gpt1_forward, params=params, cfg=cfg))
    logits = fwd(idx)
    jax.block_until_ready(logits)

    assert logits.shape == (B, T, cfg["vocab_size"]), logits.shape
    assert bool(jnp.all(jnp.isfinite(logits)))
    print("KERNEL_OK")
</pallas_src>

<mosaic_0001>
module attributes {stable_mosaic.version = 11 : i64} {
  func.func @_attn_block_kernel(%arg0: i32, %arg1: memref<1x16x128xf32, #tpu.memory_space<vmem>>, %arg2: memref<128x384xbf16, #tpu.memory_space<vmem>>, %arg3: memref<1x384xf32, #tpu.memory_space<vmem>>, %arg4: memref<128x128xbf16, #tpu.memory_space<vmem>>, %arg5: memref<1x128xf32, #tpu.memory_space<vmem>>, %arg6: memref<1x128xf32, #tpu.memory_space<vmem>>, %arg7: memref<1x128xf32, #tpu.memory_space<vmem>>, %arg8: memref<1x16x128xf32, #tpu.memory_space<vmem>>) attributes {dimension_semantics = [#tpu.dimension_semantics<parallel>], iteration_bounds = array<i64: 2>, scalar_prefetch = 0 : i64, scratch_operands = 0 : i64, tpu.core_type = #tpu.core_type<tc>, window_params = [{transform_indices = @transform_0, window_bounds = array<i64: 1, 16, 128>}, {pipeline_mode = #tpu.pipeline_mode<synchronous>, transform_indices = @transform_1, window_bounds = array<i64: 128, 384>}, {pipeline_mode = #tpu.pipeline_mode<synchronous>, transform_indices = @transform_2, window_bounds = array<i64: 1, 384>}, {pipeline_mode = #tpu.pipeline_mode<synchronous>, transform_indices = @transform_3, window_bounds = array<i64: 128, 128>}, {pipeline_mode = #tpu.pipeline_mode<synchronous>, transform_indices = @transform_4, window_bounds = array<i64: 1, 128>}, {pipeline_mode = #tpu.pipeline_mode<synchronous>, transform_indices = @transform_5, window_bounds = array<i64: 1, 128>}, {pipeline_mode = #tpu.pipeline_mode<synchronous>, transform_indices = @transform_6, window_bounds = array<i64: 1, 128>}, {transform_indices = @transform_7, window_bounds = array<i64: 1, 16, 128>}]} {
    %c0 = arith.constant 0 : index
    %c0_0 = arith.constant 0 : index
    %c0_1 = arith.constant 0 : index
    %0 = vector.load %arg1[%c0, %c0_0, %c0_1] : memref<1x16x128xf32, #tpu.memory_space<vmem>>, vector<1x16x128xf32>
    %1 = vector.shape_cast %0 : vector<1x16x128xf32> to vector<16x128xf32>
    %2 = arith.truncf %1 : vector<16x128xf32> to vector<16x128xbf16>
    %c0_2 = arith.constant 0 : index
    %c0_3 = arith.constant 0 : index
    %3 = vector.load %arg2[%c0_2, %c0_3] : memref<128x384xbf16, #tpu.memory_space<vmem>>, vector<128x384xbf16>
    %cst = arith.constant dense<0.000000e+00> : vector<16x384xf32>
    %4 = tpu.matmul %2, %3, %cst {dimension_numbers = #tpu.dot_dimension_numbers<[1], [0], [0], [1], [0, 0, 1, 1], [], []>} : vector<16x128xbf16>, vector<128x384xbf16>, vector<16x384xf32> -> vector<16x384xf32>
    %c0_4 = arith.constant 0 : index
    %c0_5 = arith.constant 0 : index
    %5 = vector.load %arg3[%c0_4, %c0_5] : memref<1x384xf32, #tpu.memory_space<vmem>>, vector<1x384xf32>
    %6 = vector.broadcast %5 : vector<1x384xf32> to vector<16x384xf32>
    %7 = arith.addf %4, %6 : vector<16x384xf32>
    %8 = arith.truncf %7 : vector<16x384xf32> to vector<16x384xbf16>
    %9 = vector.extract_strided_slice %8 {offsets = [0, 0], sizes = [16, 128], strides = [1, 1]} : vector<16x384xbf16> to vector<16x128xbf16>
    %10 = vector.shape_cast %9 : vector<16x128xbf16> to vector<16x4x32xbf16>
    %11 = tpu.transpose %10, [1, 0, 2] : vector<16x4x32xbf16> -> vector<4x16x32xbf16>
    %12 = vector.extract_strided_slice %8 {offsets = [0, 128], sizes = [16, 128], strides = [1, 1]} : vector<16x384xbf16> to vector<16x128xbf16>
    %13 = vector.shape_cast %12 : vector<16x128xbf16> to vector<16x4x32xbf16>
    %14 = tpu.transpose %13, [1, 0, 2] : vector<16x4x32xbf16> -> vector<4x16x32xbf16>
    %15 = vector.extract_strided_slice %8 {offsets = [0, 256], sizes = [16, 128], strides = [1, 1]} : vector<16x384xbf16> to vector<16x128xbf16>
    %16 = vector.shape_cast %15 : vector<16x128xbf16> to vector<16x4x32xbf16>
    %17 = tpu.transpose %16, [1, 0, 2] : vector<16x4x32xbf16> -> vector<4x16x32xbf16>
    %cst_6 = arith.constant dense<0.000000e+00> : vector<4x16x16xf32>
    %18 = tpu.matmul %11, %14, %cst_6 {dimension_numbers = #tpu.dot_dimension_numbers<[2], [2], [1], [1], [0, 0, 0, 1, 1, 1], [0], [0]>} : vector<4x16x32xbf16>, vector<4x16x32xbf16>, vector<4x16x16xf32> -> vector<4x16x16xf32>
    %cst_7 = arith.constant 0.176776692 : f32
    %19 = vector.broadcast %cst_7 : f32 to vector<4x16x16xf32>
    %20 = arith.mulf %18, %19 : vector<4x16x16xf32>
    %21 = tpu.iota {dimensions = array<i32: 0>} : vector<16x16xi32>
    %22 = tpu.iota {dimensions = array<i32: 1>} : vector<16x16xi32>
    %23 = arith.cmpi sle, %22, %21 : vector<16x16xi32>
    %24 = vector.shape_cast %23 : vector<16x16xi1> to vector<1x16x16xi1>
    %cst_8 = arith.constant -1.000000e+30 : f32
    %25 = vector.shape_cast %24 : vector<1x16x16xi1> to vector<1x16x16xi1>
    %26 = vector.broadcast %25 : vector<1x16x16xi1> to vector<4x16x16xi1>
    %27 = vector.broadcast %cst_8 : f32 to vector<4x16x16xf32>
    %28 = arith.select %26, %20, %27 : vector<4x16x16xi1>, vector<4x16x16xf32>
    %cst_9 = arith.constant dense<0xFF800000> : vector<4x16xf32>
    %29 = vector.multi_reduction <maximumf>, %28, %cst_9 [2] : vector<4x16x16xf32> to vector<4x16xf32>
    %30 = vector.shape_cast %29 : vector<4x16xf32> to vector<4x16x1xf32>
    %31 = vector.broadcast %30 : vector<4x16x1xf32> to vector<4x16x16xf32>
    %32 = arith.subf %28, %31 : vector<4x16x16xf32>
    %33 = math.exp %32 : vector<4x16x16xf32>
    %cst_10 = arith.constant dense<0.000000e+00> : vector<4x16xf32>
    %34 = vector.multi_reduction <add>, %33, %cst_10 [2] : vector<4x16x16xf32> to vector<4x16xf32>
    %35 = vector.shape_cast %34 : vector<4x16xf32> to vector<4x16x1xf32>
    %36 = tpu.reciprocal %35 {approx = true} : vector<4x16x1xf32> -> vector<4x16x1xf32>
    %37 = vector.broadcast %36 : vector<4x16x1xf32> to vector<4x16x16xf32>
    %38 = arith.mulf %33, %37 : vector<4x16x16xf32>
    %39 = arith.truncf %38 : vector<4x16x16xf32> to vector<4x16x16xbf16>
    %cst_11 = arith.constant dense<0.000000e+00> : vector<4x16x32xf32>
    %40 = tpu.matmul %39, %17, %cst_11 {dimension_numbers = #tpu.dot_dimension_numbers<[2], [1], [1], [2], [0, 0, 0, 1, 1, 2], [0], [0]>} : vector<4x16x16xbf16>, vector<4x16x32xbf16>, vector<4x16x32xf32> -> vector<4x16x32xf32>
    %41 = tpu.transpose %40, [1, 0, 2] : vector<4x16x32xf32> -> vector<16x4x32xf32>
    %42 = vector.shape_cast %41 : vector<16x4x32xf32> to vector<16x128xf32>
    %43 = arith.truncf %42 : vector<16x128xf32> to vector<16x128xbf16>
    %c0_12 = arith.constant 0 : index
    %c0_13 = arith.constant 0 : index
    %44 = vector.load %arg4[%c0_12, %c0_13] : memref<128x128xbf16, #tpu.memory_space<vmem>>, vector<128x128xbf16>
    %cst_14 = arith.constant dense<0.000000e+00> : vector<16x128xf32>
    %45 = tpu.matmul %43, %44, %cst_14 {dimension_numbers = #tpu.dot_dimension_numbers<[1], [0], [0], [1], [0, 0, 1, 1], [], []>} : vector<16x128xbf16>, vector<128x128xbf16>, vector<16x128xf32> -> vector<16x128xf32>
    %c0_15 = arith.constant 0 : index
    %c0_16 = arith.constant 0 : index
    %46 = vector.load %arg5[%c0_15, %c0_16] : memref<1x128xf32, #tpu.memory_space<vmem>>, vector<1x128xf32>
    %47 = vector.broadcast %46 : vector<1x128xf32> to vector<16x128xf32>
    %48 = arith.addf %45, %47 : vector<16x128xf32>
    %49 = arith.addf %48, %1 : vector<16x128xf32>
    %c0_17 = arith.constant 0 : index
    %c0_18 = arith.constant 0 : index
    %50 = vector.load %arg6[%c0_17, %c0_18] : memref<1x128xf32, #tpu.memory_space<vmem>>, vector<1x128xf32>
    %c0_19 = arith.constant 0 : index
    %c0_20 = arith.constant 0 : index
    %51 = vector.load %arg7[%c0_19, %c0_20] : memref<1x128xf32, #tpu.memory_space<vmem>>, vector<1x128xf32>
    %cst_21 = arith.constant dense<0.000000e+00> : vector<16xf32>
    %52 = vector.multi_reduction <add>, %49, %cst_21 [1] : vector<16x128xf32> to vector<16xf32>
    %53 = vector.shape_cast %52 : vector<16xf32> to vector<16x1xf32>
    %cst_22 = arith.constant 1.280000e+02 : f32
    %54 = vector.broadcast %cst_22 : f32 to vector<16x1xf32>
    %55 = arith.divf %53, %54 : vector<16x1xf32>
    %56 = vector.broadcast %55 : vector<16x1xf32> to vector<16x128xf32>
    %57 = arith.subf %49, %56 : vector<16x128xf32>
    %58 = arith.mulf %57, %57 : vector<16x128xf32>
    %cst_23 = arith.constant dense<0.000000e+00> : vector<16xf32>
    %59 = vector.multi_reduction <add>, %58, %cst_23 [1] : vector<16x128xf32> to vector<16xf32>
    %60 = vector.shape_cast %59 : vector<16xf32> to vector<16x1xf32>
    %cst_24 = arith.constant 1.280000e+02 : f32
    %61 = vector.broadcast %cst_24 : f32 to vector<16x1xf32>
    %62 = arith.divf %60, %61 : vector<16x1xf32>
    %63 = vector.broadcast %55 : vector<16x1xf32> to vector<16x128xf32>
    %64 = arith.subf %49, %63 : vector<16x128xf32>
    %cst_25 = arith.constant 9.99999974E-6 : f32
    %65 = vector.broadcast %cst_25 : f32 to vector<16x1xf32>
    %66 = arith.addf %62, %65 : vector<16x1xf32>
    %67 = math.rsqrt %66 : vector<16x1xf32>
    %68 = vector.broadcast %67 : vector<16x1xf32> to vector<16x128xf32>
    %69 = arith.mulf %64, %68 : vector<16x128xf32>
    %70 = vector.broadcast %50 : vector<1x128xf32> to vector<16x128xf32>
    %71 = arith.mulf %69, %70 : vector<16x128xf32>
    %72 = vector.broadcast %51 : vector<1x128xf32> to vector<16x128xf32>
    %73 = arith.addf %71, %72 : vector<16x128xf32>
    %c0_26 = arith.constant 0 : index
    %c0_27 = arith.constant 0 : index
    %c0_28 = arith.constant 0 : index
    %74 = vector.load %arg8[%c0_26, %c0_27, %c0_28] : memref<1x16x128xf32, #tpu.memory_space<vmem>>, vector<1x16x128xf32>
    %75 = vector.shape_cast %74 : vector<1x16x128xf32> to vector<16x128xf32>
    %76 = vector.shape_cast %73 : vector<16x128xf32> to vector<1x16x128xf32>
    tpu.vector_store %arg8[%c0_26, %c0_27, %c0_28], %76 {strides = array<i32>} : memref<1x16x128xf32, #tpu.memory_space<vmem>>, vector<1x16x128xf32>,
    return
  }
  func.func @transform_0(%arg0: i32) -> (i32, i32, i32) {
    %c0_i32 = arith.constant 0 : i32
    %c0_i32_0 = arith.constant 0 : i32
    %c0_i32_1 = arith.constant 0 : i32
    return %arg0, %c0_i32, %c0_i32_0 : i32, i32, i32
  }
  func.func @transform_1(%arg0: i32) -> (i32, i32) {
    %c0_i32 = arith.constant 0 : i32
    %c0_i32_0 = arith.constant 0 : i32
    %c0_i32_1 = arith.constant 0 : i32
    return %c0_i32, %c0_i32_0 : i32, i32
  }
  func.func @transform_2(%arg0: i32) -> (i32, i32) {
    %c0_i32 = arith.constant 0 : i32
    %c0_i32_0 = arith.constant 0 : i32
    %c0_i32_1 = arith.constant 0 : i32
    return %c0_i32, %c0_i32_0 : i32, i32
  }
  func.func @transform_3(%arg0: i32) -> (i32, i32) {
    %c0_i32 = arith.constant 0 : i32
    %c0_i32_0 = arith.constant 0 : i32
    %c0_i32_1 = arith.constant 0 : i32
    return %c0_i32, %c0_i32_0 : i32, i32
  }
  func.func @transform_4(%arg0: i32) -> (i32, i32) {
    %c0_i32 = arith.constant 0 : i32
    %c0_i32_0 = arith.constant 0 : i32
    %c0_i32_1 = arith.constant 0 : i32
    return %c0_i32, %c0_i32_0 : i32, i32
  }
  func.func @transform_5(%arg0: i32) -> (i32, i32) {
    %c0_i32 = arith.constant 0 : i32
    %c0_i32_0 = arith.constant 0 : i32
    %c0_i32_1 = arith.constant 0 : i32
    return %c0_i32, %c0_i32_0 : i32, i32
  }
  func.func @transform_6(%arg0: i32) -> (i32, i32) {
    %c0_i32 = arith.constant 0 : i32
    %c0_i32_0 = arith.constant 0 : i32
    %c0_i32_1 = arith.constant 0 : i32
    return %c0_i32, %c0_i32_0 : i32, i32
  }
  func.func @transform_7(%arg0: i32) -> (i32, i32, i32) {
    %c0_i32 = arith.constant 0 : i32
    %c0_i32_0 = arith.constant 0 : i32
    %c0_i32_1 = arith.constant 0 : i32
    return %arg0, %c0_i32, %c0_i32_0 : i32, i32, i32
  }
}

module attributes {stable_mosaic.version = 11 : i64} {
  func.func @_mlp_add_ln_kernel(%arg0: i32, %arg1: memref<32x128xf32, #tpu.memory_space<vmem>>, %arg2: memref<128x512xbf16, #tpu.memory_space<vmem>>, %arg3: memref<1x512xf32, #tpu.memory_space<vmem>>, %arg4: memref<512x128xbf16, #tpu.memory_space<vmem>>, %arg5: memref<1x128xf32, #tpu.memory_space<vmem>>, %arg6: memref<1x128xf32, #tpu.memory_space<vmem>>, %arg7: memref<1x128xf32, #tpu.memory_space<vmem>>, %arg8: memref<32x128xf32, #tpu.memory_space<vmem>>) attributes {dimension_semantics = [#tpu.dimension_semantics<parallel>], iteration_bounds = array<i64: 1>, scalar_prefetch = 0 : i64, scratch_operands = 0 : i64, tpu.core_type = #tpu.core_type<tc>, window_params = [{transform_indices = @transform_0, window_bounds = array<i64: 32, 128>}, {pipeline_mode = #tpu.pipeline_mode<synchronous>, transform_indices = @transform_1, window_bounds = array<i64: 128, 512>}, {pipeline_mode = #tpu.pipeline_mode<synchronous>, transform_indices = @transform_2, window_bounds = array<i64: 1, 512>}, {pipeline_mode = #tpu.pipeline_mode<synchronous>, transform_indices = @transform_3, window_bounds = array<i64: 512, 128>}, {pipeline_mode = #tpu.pipeline_mode<synchronous>, transform_indices = @transform_4, window_bounds = array<i64: 1, 128>}, {pipeline_mode = #tpu.pipeline_mode<synchronous>, transform_indices = @transform_5, window_bounds = array<i64: 1, 128>}, {pipeline_mode = #tpu.pipeline_mode<synchronous>, transform_indices = @transform_6, window_bounds = array<i64: 1, 128>}, {transform_indices = @transform_7, window_bounds = array<i64: 32, 128>}]} {
    %c0 = arith.constant 0 : index
    %c0_0 = arith.constant 0 : index
    %0 = vector.load %arg1[%c0, %c0_0] : memref<32x128xf32, #tpu.memory_space<vmem>>, vector<32x128xf32>
    %1 = arith.truncf %0 : vector<32x128xf32> to vector<32x128xbf16>
    %c0_1 = arith.constant 0 : index
    %c0_2 = arith.constant 0 : index
    %2 = vector.load %arg2[%c0_1, %c0_2] : memref<128x512xbf16, #tpu.memory_space<vmem>>, vector<128x512xbf16>
    %cst = arith.constant dense<0.000000e+00> : vector<32x512xf32>
    %3 = tpu.matmul %1, %2, %cst {dimension_numbers = #tpu.dot_dimension_numbers<[1], [0], [0], [1], [0, 0, 1, 1], [], []>} : vector<32x128xbf16>, vector<128x512xbf16>, vector<32x512xf32> -> vector<32x512xf32>
    %c0_3 = arith.constant 0 : index
    %c0_4 = arith.constant 0 : index
    %4 = vector.load %arg3[%c0_3, %c0_4] : memref<1x512xf32, #tpu.memory_space<vmem>>, vector<1x512xf32>
    %5 = vector.broadcast %4 : vector<1x512xf32> to vector<32x512xf32>
    %6 = arith.addf %3, %5 : vector<32x512xf32>
    %cst_5 = arith.constant 5.000000e-01 : f32
    %7 = vector.broadcast %cst_5 : f32 to vector<32x512xf32>
    %8 = arith.mulf %7, %6 : vector<32x512xf32>
    %cst_6 = arith.constant 0.707106769 : f32
    %9 = vector.broadcast %cst_6 : f32 to vector<32x512xf32>
    %10 = arith.mulf %6, %9 : vector<32x512xf32>
    %11 = math.erf %10 : vector<32x512xf32>
    %cst_7 = arith.constant 1.000000e+00 : f32
    %12 = vector.broadcast %cst_7 : f32 to vector<32x512xf32>
    %13 = arith.addf %12, %11 : vector<32x512xf32>
    %14 = arith.mulf %8, %13 : vector<32x512xf32>
    %15 = arith.truncf %14 : vector<32x512xf32> to vector<32x512xbf16>
    %c0_8 = arith.constant 0 : index
    %c0_9 = arith.constant 0 : index
    %16 = vector.load %arg4[%c0_8, %c0_9] : memref<512x128xbf16, #tpu.memory_space<vmem>>, vector<512x128xbf16>
    %cst_10 = arith.constant dense<0.000000e+00> : vector<32x128xf32>
    %17 = tpu.matmul %15, %16, %cst_10 {dimension_numbers = #tpu.dot_dimension_numbers<[1], [0], [0], [1], [0, 0, 1, 1], [], []>} : vector<32x512xbf16>, vector<512x128xbf16>, vector<32x128xf32> -> vector<32x128xf32>
    %c0_11 = arith.constant 0 : index
    %c0_12 = arith.constant 0 : index
    %18 = vector.load %arg5[%c0_11, %c0_12] : memref<1x128xf32, #tpu.memory_space<vmem>>, vector<1x128xf32>
    %19 = vector.broadcast %18 : vector<1x128xf32> to vector<32x128xf32>
    %20 = arith.addf %17, %19 : vector<32x128xf32>
    %21 = arith.addf %20, %0 : vector<32x128xf32>
    %c0_13 = arith.constant 0 : index
    %c0_14 = arith.constant 0 : index
    %22 = vector.load %arg6[%c0_13, %c0_14] : memref<1x128xf32, #tpu.memory_space<vmem>>, vector<1x128xf32>
    %c0_15 = arith.constant 0 : index
    %c0_16 = arith.constant 0 : index
    %23 = vector.load %arg7[%c0_15, %c0_16] : memref<1x128xf32, #tpu.memory_space<vmem>>, vector<1x128xf32>
    %cst_17 = arith.constant dense<0.000000e+00> : vector<32xf32>
    %24 = vector.multi_reduction <add>, %21, %cst_17 [1] : vector<32x128xf32> to vector<32xf32>
    %25 = vector.shape_cast %24 : vector<32xf32> to vector<32x1xf32>
    %cst_18 = arith.constant 1.280000e+02 : f32
    %26 = vector.broadcast %cst_18 : f32 to vector<32x1xf32>
    %27 = arith.divf %25, %26 : vector<32x1xf32>
    %28 = vector.broadcast %27 : vector<32x1xf32> to vector<32x128xf32>
    %29 = arith.subf %21, %28 : vector<32x128xf32>
    %30 = arith.mulf %29, %29 : vector<32x128xf32>
    %cst_19 = arith.constant dense<0.000000e+00> : vector<32xf32>
    %31 = vector.multi_reduction <add>, %30, %cst_19 [1] : vector<32x128xf32> to vector<32xf32>
    %32 = vector.shape_cast %31 : vector<32xf32> to vector<32x1xf32>
    %cst_20 = arith.constant 1.280000e+02 : f32
    %33 = vector.broadcast %cst_20 : f32 to vector<32x1xf32>
    %34 = arith.divf %32, %33 : vector<32x1xf32>
    %35 = vector.broadcast %27 : vector<32x1xf32> to vector<32x128xf32>
    %36 = arith.subf %21, %35 : vector<32x128xf32>
    %cst_21 = arith.constant 9.99999974E-6 : f32
    %37 = vector.broadcast %cst_21 : f32 to vector<32x1xf32>
    %38 = arith.addf %34, %37 : vector<32x1xf32>
    %39 = math.rsqrt %38 : vector<32x1xf32>
    %40 = vector.broadcast %39 : vector<32x1xf32> to vector<32x128xf32>
    %41 = arith.mulf %36, %40 : vector<32x128xf32>
    %42 = vector.broadcast %22 : vector<1x128xf32> to vector<32x128xf32>
    %43 = arith.mulf %41, %42 : vector<32x128xf32>
    %44 = vector.broadcast %23 : vector<1x128xf32> to vector<32x128xf32>
    %45 = arith.addf %43, %44 : vector<32x128xf32>
    %c0_22 = arith.constant 0 : index
    %c0_23 = arith.constant 0 : index
    %46 = vector.load %arg8[%c0_22, %c0_23] : memref<32x128xf32, #tpu.memory_space<vmem>>, vector<32x128xf32>
    tpu.vector_store %arg8[%c0_22, %c0_23], %45 {strides = array<i32>} : memref<32x128xf32, #tpu.memory_space<vmem>>, vector<32x128xf32>,
    return
  }
  func.func @transform_0(%arg0: i32) -> (i32, i32) {
    %c0_i32 = arith.constant 0 : i32
    %c0_i32_0 = arith.constant 0 : i32
    return %arg0, %c0_i32 : i32, i32
  }
  func.func @transform_1(%arg0: i32) -> (i32, i32) {
    %c0_i32 = arith.constant 0 : i32
    %c0_i32_0 = arith.constant 0 : i32
    %c0_i32_1 = arith.constant 0 : i32
    return %c0_i32, %c0_i32_0 : i32, i32
  }
  func.func @transform_2(%arg0: i32) -> (i32, i32) {
    %c0_i32 = arith.constant 0 : i32
    %c0_i32_0 = arith.constant 0 : i32
    %c0_i32_1 = arith.constant 0 : i32
    return %c0_i32, %c0_i32_0 : i32, i32
  }
  func.func @transform_3(%arg0: i32) -> (i32, i32) {
    %c0_i32 = arith.constant 0 : i32
    %c0_i32_0 = arith.constant 0 : i32
    %c0_i32_1 = arith.constant 0 : i32
    return %c0_i32, %c0_i32_0 : i32, i32
  }
  func.func @transform_4(%arg0: i32) -> (i32, i32) {
    %c0_i32 = arith.constant 0 : i32
    %c0_i32_0 = arith.constant 0 : i32
    %c0_i32_1 = arith.constant 0 : i32
    return %c0_i32, %c0_i32_0 : i32, i32
  }
  func.func @transform_5(%arg0: i32) -> (i32, i32) {
    %c0_i32 = arith.constant 0 : i32
    %c0_i32_0 = arith.constant 0 : i32
    %c0_i32_1 = arith.constant 0 : i32
    return %c0_i32, %c0_i32_0 : i32, i32
  }
  func.func @transform_6(%arg0: i32) -> (i32, i32) {
    %c0_i32 = arith.constant 0 : i32
    %c0_i32_0 = arith.constant 0 : i32
    %c0_i32_1 = arith.constant 0 : i32
    return %c0_i32, %c0_i32_0 : i32, i32
  }
  func.func @transform_7(%arg0: i32) -> (i32, i32) {
    %c0_i32 = arith.constant 0 : i32
    %c0_i32_0 = arith.constant 0 : i32
    return %arg0, %c0_i32 : i32, i32
  }
}

module attributes {stable_mosaic.version = 11 : i64} {
  func.func @_head_kernel(%arg0: i32, %arg1: i32, %arg2: memref<32x128xbf16, #tpu.memory_space<vmem>>, %arg3: memref<256x128xbf16, #tpu.memory_space<vmem>>, %arg4: memref<32x256xf32, #tpu.memory_space<vmem>>) attributes {dimension_semantics = [#tpu.dimension_semantics<parallel>, #tpu.dimension_semantics<parallel>], iteration_bounds = array<i64: 1, 1>, scalar_prefetch = 0 : i64, scratch_operands = 0 : i64, tpu.core_type = #tpu.core_type<tc>, window_params = [{transform_indices = @transform_0, window_bounds = array<i64: 32, 128>}, {transform_indices = @transform_1, window_bounds = array<i64: 256, 128>}, {transform_indices = @transform_2, window_bounds = array<i64: 32, 256>}]} {
    %c0 = arith.constant 0 : index
    %c0_0 = arith.constant 0 : index
    %0 = vector.load %arg2[%c0, %c0_0] : memref<32x128xbf16, #tpu.memory_space<vmem>>, vector<32x128xbf16>
    %c0_1 = arith.constant 0 : index
    %c0_2 = arith.constant 0 : index
    %1 = vector.load %arg3[%c0_1, %c0_2] : memref<256x128xbf16, #tpu.memory_space<vmem>>, vector<256x128xbf16>
    %cst = arith.constant dense<0.000000e+00> : vector<32x256xf32>
    %2 = tpu.matmul %0, %1, %cst {dimension_numbers = #tpu.dot_dimension_numbers<[1], [1], [0], [0], [0, 0, 1, 0], [], []>} : vector<32x128xbf16>, vector<256x128xbf16>, vector<32x256xf32> -> vector<32x256xf32>
    %c0_3 = arith.constant 0 : index
    %c0_4 = arith.constant 0 : index
    %3 = vector.load %arg4[%c0_3, %c0_4] : memref<32x256xf32, #tpu.memory_space<vmem>>, vector<32x256xf32>
    tpu.vector_store %arg4[%c0_3, %c0_4], %2 {strides = array<i32>} : memref<32x256xf32, #tpu.memory_space<vmem>>, vector<32x256xf32>,
    return
  }
  func.func @transform_0(%arg0: i32, %arg1: i32) -> (i32, i32) {
    %c0_i32 = arith.constant 0 : i32
    %c0_i32_0 = arith.constant 0 : i32
    return %arg0, %c0_i32 : i32, i32
  }
  func.func @transform_1(%arg0: i32, %arg1: i32) -> (i32, i32) {
    %c0_i32 = arith.constant 0 : i32
    %c0_i32_0 = arith.constant 0 : i32
    return %arg1, %c0_i32 : i32, i32
  }
  func.func @transform_2(%arg0: i32, %arg1: i32) -> (i32, i32) {
    %c0_i32 = arith.constant 0 : i32
    return %arg0, %arg1 : i32, i32
  }
}

</mosaic_0001>

<bundles_post_ra>
// kernel: gpt1_forward.9
= control target key start
LH: loop header
LB: loop body
LE: loop exit
PB: predicated region body
PF: predicated region fallthrough
CT: control target
= control target key end

     0   :  { %s417_s0 = inlined_call_operand.vmem [shape: bf16[32,128], index: 0, kind: input, shape index: {}]   ;;  %s418_s1 = inlined_call_operand.vmem [shape: bf16[256,128], index: 1, kind: input, shape index: {}]   ;;  %s419_s2 = inlined_call_operand.hbm [shape: f32[32,256], index: 2, kind: output, shape index: {}]  }
   0x1   :  { %v291_v0 = vld [vmem:[%s418_s1 + $0x40] sm:$0xff]   ;;  %v293_v2 = vld [vmem:[%s418_s1 + $0x48] sm:$0xff]   ;;  %v295_v4 = vld [vmem:[%s418_s1 + $0x50] sm:$0xff]  }
   0x2   :  { %v292_v1 = vld [vmem:[%s418_s1] sm:$0xff]   ;;  %252 = vmatprep.subr.bf16.mxu0 %v291_v0  ;;  %272 = vmatprep.subr.bf16.mxu1 %v291_v0  ;;  %v294_v3 = vld [vmem:[%s418_s1 + $0x8] sm:$0xff]   ;;  %v296_v5 = vld [vmem:[%s418_s1 + $0x10] sm:$0xff]  }
   0x3   :  { %253 = vmatpush3.bf16.xpose.msra.mxu0 %v292_v1  ;;  %280 = vmatpush3.bf16.xpose.msra.mxu1 %v292_v1  ;;  %v297_v6 = vld [vmem:[%s418_s1 + $0x58] sm:$0xff]   ;;  %v307_v7 = vld [vmem:[%s417_s0] sm:$0xff]   ;;  %v308_v8 = vld [vmem:[%s417_s0 + $0x8] sm:$0xff]  }
   0x4   :  { %254 = vmatprep.subr.bf16.mxu0 %v293_v2  ;;  %273 = vmatprep.subr.bf16.mxu1 %v293_v2 }
   0x5   :  { %268 = vmatprep.mubr.bf16.mxu0 %v307_v7 }
   0xb   :  { %255 = vmatpush3.bf16.xpose.msra.mxu0 %v294_v3  ;;  %281 = vmatpush3.bf16.xpose.msra.mxu1 %v294_v3 }
   0xc   :  { %256 = vmatprep.subr.bf16.mxu0 %v295_v4  ;;  %274 = vmatprep.subr.bf16.mxu1 %v295_v4 }
   0xd   :  { %7 = vsyncpa [#allocation3], 0  ;;  %270 = vmatprep.mubr.bf16.mxu1 %v308_v8  ;;  %v298_v9 = vld [vmem:[%s418_s1 + $0x18] sm:$0xff]   ;;  %v299_v10 = vld [vmem:[%s418_s1 + $0x60] sm:$0xff]   ;;  %s333_s16 = smov [#allocation2]  }
   0xe   :  { %v300_v11 = vld [vmem:[%s418_s1 + $0x20] sm:$0xff]   ;;  %v301_v12 = vld [vmem:[%s418_s1 + $0x68] sm:$0xff]   ;;  %v303_v14 = vld [vmem:[%s418_s1 + $0x70] sm:$0xff]   ;;  %s223_s17 = sshll.u32 %s333_s16, 4  ;;  %s224_s17 = int_to_ptr.vmem [resolvable:$true] %s223_s17 }
   0xf   :  { %v302_v13 = vld [vmem:[%s418_s1 + $0x28] sm:$0xff]   ;;  %v304_v15 = vld [vmem:[%s418_s1 + $0x30] sm:$0xff]   ;;  %v305_v16 = vld [vmem:[%s418_s1 + $0x78] sm:$0xff]   ;;  %p314_p1 = scmp.lt.s32.totalorder %s224_s17, %s224_s17 }
  0x10   :  { %v306_v17 = vld [vmem:[%s418_s1 + $0x38] sm:$0xff]   ;;  %s309_s1 = scalar_lea.vmem %s224_s17, 1024 }
  0x11   :  { %p310_p0 = scmp.ne.s32.totalorder %s224_s17, %s309_s1  ;;  %p315_p2 = scmp.lt.s32.totalorder %s309_s1, %s309_s1 }
  0x13   :  { %257 = vmatpush3.bf16.xpose.msra.mxu0 %v296_v5  ;;  %282 = vmatpush3.bf16.xpose.msra.mxu1 %v296_v5  ;;  %p316_p3 = por %p315_p2, %p314_p1 }
  0x14   :  { %258 = vmatprep.subr.bf16.mxu0 %v297_v6  ;;  %275 = vmatprep.subr.bf16.mxu1 %v297_v6 }
  0x15   :  { %p317_p4 = pnand %p316_p3, %p310_p0 }
  0x1b   :  { %259 = vmatpush3.bf16.xpose.msra.mxu0 %v298_v9  ;;  %283 = vmatpush3.bf16.xpose.msra.mxu1 %v298_v9 }
  0x1c   :  { %260 = vmatprep.subr.bf16.mxu0 %v299_v10  ;;  %276 = vmatprep.subr.bf16.mxu1 %v299_v10 }
  0x23   :  { %261 = vmatpush3.bf16.xpose.msra.mxu0 %v300_v11  ;;  %284 = vmatpush3.bf16.xpose.msra.mxu1 %v300_v11 }
  0x24   :  { %262 = vmatprep.subr.bf16.mxu0 %v301_v12  ;;  %277 = vmatprep.subr.bf16.mxu1 %v301_v12 }
  0x2b   :  { %263 = vmatpush3.bf16.xpose.msra.mxu0 %v302_v13  ;;  %285 = vmatpush3.bf16.xpose.msra.mxu1 %v302_v13 }
  0x2c   :  { %264 = vmatprep.subr.bf16.mxu0 %v303_v14  ;;  %278 = vmatprep.subr.bf16.mxu1 %v303_v14 }
  0x33   :  { %265 = vmatpush3.bf16.xpose.msra.mxu0 %v304_v15  ;;  %286 = vmatpush3.bf16.xpose.msra.mxu1 %v304_v15 }
  0x34   :  { %266 = vmatprep.subr.bf16.mxu0 %v305_v16  ;;  %279 = vmatprep.subr.bf16.mxu1 %v305_v16 }
  0x3b   :  { %267 = vmatpush3.bf16.xpose.msra.mxu0 %v306_v17  ;;  %287 = vmatpush3.bf16.xpose.msra.mxu1 %v306_v17 }
  0x42   :  { %269 = vmatmul.mubr.bf16.vlgmr.msra.gmra.mrb[0].mxu0 %v307_v7  ;;  %271 = vmatmul.mubr.bf16.vlgmr.msra.gmra.mrb[0].mxu1 %v308_v8 }
 0x115   :  { %v191_v18 = vpop.f32.mrb[0].mxu0  ;;  %v201_v19 = vpop.f32.mrb[0].mxu1 }
 0x116   :  { %210 = vst [vmem:[#allocation2] sm:$0xff] %v191_v18  ;;  %214 = vst [vmem:[#allocation2 + $0x20] sm:$0xff] %v201_v19  ;;  %v193_v20 = vpop.f32.mrb[1].mxu0  ;;  %v203_v21 = vpop.f32.mrb[1].mxu1 }
 0x117   :  { %211 = vst [vmem:[#allocation2 + $0x8] sm:$0xff] %v193_v20  ;;  %215 = vst [vmem:[#allocation2 + $0x28] sm:$0xff] %v203_v21  ;;  %v195_v22 = vpop.f32.mrb[2].mxu0  ;;  %v205_v23 = vpop.f32.mrb[2].mxu1 }
 0x118   :  { %212 = vst [vmem:[#allocation2 + $0x10] sm:$0xff] %v195_v22  ;;  %216 = vst [vmem:[#allocation2 + $0x30] sm:$0xff] %v205_v23  ;;  %v197_v24 = vpop.f32.mrb[3].mxu0  ;;  %v207_v25 = vpop.f32.mrb[3].mxu1 }
 0x119   :  { %213 = vst [vmem:[#allocation2 + $0x18] sm:$0xff] %v197_v24  ;;  %217 = vst [vmem:[#allocation2 + $0x38] sm:$0xff] %v207_v25 }
 0x11a   :  { %320 = shalt.err (!%p317_p4)
}
 0x11b   :  { %s321_s20 = scalar_lea.hbm %s419_s2, 1024 }
 0x11c   :  { %p322_p5 = scmp.ne.s32.totalorder %s419_s2, %s321_s20  ;;  %p325_p6 = scmp.lt.u32.totalorder %s321_s20, %s419_s2 }
 0x11e   :  { %p327_p7 = pnand %p325_p6, %p322_p5 }
 0x120   :  { %330 = shalt.err (!%p327_p7)
}
 0x121   :  { %s334_s25 = smov 256   ;;  %s335_s26 = smov 16  }
 0x122   :  { %229 = dma.vmem_to_hbm [thread:$0]  %s224_s17, 1024, %s419_s2, [#allocation3], %s334_s25, %s334_s25, %s335_s26  }
 0x123   :  { %331 = dma.done.wait [#allocation3], 1024  }
 0x124   :  { %332 = vsyncadd [#allocation3], 4294966272 }
 0x125   :  { %233 = vsyncpa [#allocation3], 1 }

// kernel: gpt1_forward.6
= control target key start
LH: loop header
LB: loop body
LE: loop exit
PB: predicated region body
PF: predicated region fallthrough
CT: control target
= control target key end

     0   :  { %v1125_v1 = vmov 0   ;;  %s1450_s1 = inlined_call_operand.vmem [shape: bf16[128,512], index: 1, kind: input, shape index: {}]   ;;  %s1451_s3 = inlined_call_operand.vmem [shape: bf16[512,128], index: 3, kind: input, shape index: {}]   ;;  %s1452_s0 = inlined_call_operand.vmem [shape: f32[32,128], index: 0, kind: input, shape index: {}]   ;;  %s1453_s2 = inlined_call_operand.vmem [shape: f32[1,512], index: 2, kind: input, shape index: {}]   ;;  %s1454_s4 = inlined_call_operand.vmem [shape: f32[1,128], index: 4, kind: input, shape index: {}, may-alias: {4,6}]   ;;  %s1455_s5 = inlined_call_operand.vmem [shape: f32[1,128], index: 5, kind: input, shape index: {}]   ;;  %s1456_s6 = inlined_call_operand.vmem [shape: f32[1,128], index: 6, kind: input, shape index: {}, may-alias: {4,6}]   ;;  %s1457_s7 = inlined_call_operand.vmem [shape: f32[32,128], index: 7, kind: output, shape index: {}]  }
   0x1   :  { %v1005_v0 = vld [vmem:[%s1450_s1 + $0x4] ss:$16 sps:$4 sm:$0xff]   ;;  %279 = vmatprep.mubr.bf16.mxu0 %v1125_v1  ;;  %332 = vmatprep.mubr.bf16.mxu1 %v1125_v1  ;;  %v1007_v2 = vld [vmem:[%s1450_s1 + $0xc] ss:$16 sps:$4 sm:$0xff]   ;;  %v1009_v3 = vld [vmem:[%s1450_s1] ss:$16 sps:$4 sm:$0xff]  }
   0x2   :  { %247 = vmatprep.subr.bf16.mxu0 %v1005_v0  ;;  %v1010_v4 = vld [vmem:[%s1450_s1 + $0x8] ss:$16 sps:$4 sm:$0xff]   ;;  %300 = vmatprep.subr.bf16.mxu1 %v1007_v2  ;;  %v1011_v5 = vld [vmem:[%s1450_s1 + $0x24] ss:$16 sps:$4 sm:$0xff]   ;;  %v1013_v6 = vld [vmem:[%s1450_s1 + $0x2c] ss:$16 sps:$4 sm:$0xff]  }
   0x3   :  { %248 = vmatpush1.bf16.msra.mxu0 %v1009_v3  ;;  %301 = vmatpush1.bf16.msra.mxu1 %v1010_v4  ;;  %v1015_v7 = vld [vmem:[%s1450_s1 + $0x20] ss:$16 sps:$4 sm:$0xff]   ;;  %v1016_v8 = vld [vmem:[%s1450_s1 + $0x28] ss:$16 sps:$4 sm:$0xff]   ;;  %v1017_v9 = vld [vmem:[%s1450_s1 + $0x44] ss:$16 sps:$4 sm:$0xff]  }
   0x4   :  { %249 = vmatprep.subr.bf16.mxu0 %v1011_v5  ;;  %302 = vmatprep.subr.bf16.mxu1 %v1013_v6  ;;  %v1019_v10 = vld [vmem:[%s1450_s1 + $0x4c] ss:$16 sps:$4 sm:$0xff]   ;;  %v1021_v11 = vld [vmem:[%s1450_s1 + $0x40] ss:$16 sps:$4 sm:$0xff]   ;;  %v1022_v12 = vld [vmem:[%s1450_s1 + $0x48] ss:$16 sps:$4 sm:$0xff]  }
   0x5   :  { %v1023_v13 = vld [vmem:[%s1450_s1 + $0x64] ss:$16 sps:$4 sm:$0xff]   ;;  %v1025_v14 = vld [vmem:[%s1450_s1 + $0x6c] ss:$16 sps:$4 sm:$0xff]   ;;  %v1027_v15 = vld [vmem:[%s1450_s1 + $0x60] ss:$16 sps:$4 sm:$0xff]  }
   0x6   :  { %v1028_v16 = vld [vmem:[%s1450_s1 + $0x68] ss:$16 sps:$4 sm:$0xff]   ;;  %v1029_v17 = vld [vmem:[%s1450_s1 + $0x84] ss:$16 sps:$4 sm:$0xff]   ;;  %v1031_v18 = vld [vmem:[%s1450_s1 + $0x8c] ss:$16 sps:$4 sm:$0xff]  }
   0x7   :  { %250 = vmatpush1.bf16.msra.mxu0 %v1015_v7  ;;  %303 = vmatpush1.bf16.msra.mxu1 %v1016_v8  ;;  %v1033_v19 = vld [vmem:[%s1450_s1 + $0x80] ss:$16 sps:$4 sm:$0xff]   ;;  %v1034_v20 = vld [vmem:[%s1450_s1 + $0x88] ss:$16 sps:$4 sm:$0xff]   ;;  %v1035_v21 = vld [vmem:[%s1450_s1 + $0xa4] ss:$16 sps:$4 sm:$0xff]   ;;  %v67_v7 = vlaneseq }
   0x8   :  { %251 = vmatprep.subr.bf16.mxu0 %v1017_v9  ;;  %304 = vmatprep.subr.bf16.mxu1 %v1019_v10  ;;  %v1037_v22 = vld [vmem:[%s1450_s1 + $0xac] ss:$16 sps:$4 sm:$0xff]   ;;  %v1039_v23 = vld [vmem:[%s1450_s1 + $0xa0] ss:$16 sps:$4 sm:$0xff]   ;;  %v1040_v24 = vld [vmem:[%s1450_s1 + $0xa8] ss:$16 sps:$4 sm:$0xff]  }
   0x9   :  { %v1041_v25 = vld [vmem:[%s1450_s1 + $0xc4] ss:$16 sps:$4 sm:$0xff]   ;;  %v1043_v26 = vld [vmem:[%s1450_s1 + $0xcc] ss:$16 sps:$4 sm:$0xff]   ;;  %v1045_v27 = vld [vmem:[%s1450_s1 + $0xc0] ss:$16 sps:$4 sm:$0xff]  }
   0xa   :  { %v1046_v28 = vld [vmem:[%s1450_s1 + $0xc8] ss:$16 sps:$4 sm:$0xff]   ;;  %v1047_v29 = vld [vmem:[%s1450_s1 + $0xe4] ss:$16 sps:$4 sm:$0xff]   ;;  %v1049_v30 = vld [vmem:[%s1450_s1 + $0xec] ss:$16 sps:$4 sm:$0xff]  }
   0xb   :  { %252 = vmatpush1.bf16.msra.mxu0 %v1021_v11  ;;  %305 = vmatpush1.bf16.msra.mxu1 %v1022_v12  ;;  %v1051_v31 = vld [vmem:[%s1450_s1 + $0xe0] ss:$16 sps:$4 sm:$0xff]   ;;  %v1052_v32 = vld [vmem:[%s1450_s1 + $0xe8] ss:$16 sps:$4 sm:$0xff]   ;;  %v68_v8 = vshrl.u32 %v67_v7, 7 }
   0xc   :  { %253 = vmatprep.subr.bf16.mxu0 %v1023_v13  ;;  %306 = vmatprep.subr.bf16.mxu1 %v1025_v14  ;;  %v1267_v33 = vld [vmem:[%s1452_s0] sm:$0xff]  ;;  %v1272_v34 = vld [vmem:[%s1452_s0 + $0x8] sm:$0xff]  ;;  %v1297_v42 = vld [vmem:[%s1452_s0 + $0x10] sm:$0xff] }
   0xd   :  { %v1053_v35 = vld [vmem:[%s1451_s3 + $0x40] sm:$0xff]   ;;  %v31_v37 = vpack.c.bf16 %v1272_v34, %v1267_v33  ;;  %v1057_v40 = vld [vmem:[%s1451_s3 + $0x48] sm:$0xff]   ;;  %v1302_v43 = vld [vmem:[%s1452_s0 + $0x18] sm:$0xff]  ;;  %v69_v9 = vsub.s32 0, %v68_v8  ;;  %v77_v10 = vsub.s32 2, %v68_v8  ;;  %v73_v12 = vsub.s32 1, %v68_v8 }
   0xe   :  { %v1054_v36 = vld [vmem:[%s1451_s3 + $0xc0] sm:$0xff]   ;;  %v1058_v41 = vld [vmem:[%s1451_s3 + $0xc8] sm:$0xff]   ;;  %v32_v46 = vpack.c.bf16 %v1302_v43, %v1297_v42  ;;  %v1061_v47 = vld [vmem:[%s1451_s3 + $0x50] sm:$0xff]   ;;  %v81_v13 = vsub.s32 3, %v68_v8 }
   0xf   :  { %254 = vmatpush1.bf16.msra.mxu0 %v1027_v15  ;;  %307 = vmatpush1.bf16.msra.mxu1 %v1028_v16  ;;  %v1055_v38 = vld [vmem:[%s1451_s3] sm:$0xff]   ;;  %v1059_v44 = vld [vmem:[%s1451_s3 + $0x8] sm:$0xff]   ;;  %v1062_v48 = vld [vmem:[%s1451_s3 + $0xd0] sm:$0xff]  }
  0x10   :  { %255 = vmatprep.subr.bf16.mxu0 %v1029_v17  ;;  %308 = vmatprep.subr.bf16.mxu1 %v1031_v18  ;;  %v1056_v39 = vld [vmem:[%s1451_s3 + $0x80] sm:$0xff]   ;;  %v1060_v45 = vld [vmem:[%s1451_s3 + $0x88] sm:$0xff]   ;;  %v1063_v49 = vld [vmem:[%s1451_s3 + $0x10] sm:$0xff]  }
  0x11   :  { %v1064_v50 = vld [vmem:[%s1451_s3 + $0x90] sm:$0xff]   ;;  %v1065_v51 = vld [vmem:[%s1451_s3 + $0x58] sm:$0xff]   ;;  %v1069_v55 = vld [vmem:[%s1451_s3 + $0x60] sm:$0xff]  }
  0x12   :  { %v1066_v52 = vld [vmem:[%s1451_s3 + $0xd8] sm:$0xff]   ;;  %v1070_v56 = vld [vmem:[%s1451_s3 + $0xe0] sm:$0xff]   ;;  %v1073_v59 = vld [vmem:[%s1451_s3 + $0x68] sm:$0xff]  }
  0x13   :  { %256 = vmatpush1.bf16.msra.mxu0 %v1033_v19  ;;  %309 = vmatpush1.bf16.msra.mxu1 %v1034_v20  ;;  %v1067_v53 = vld [vmem:[%s1451_s3 + $0x18] sm:$0xff]   ;;  %v1071_v57 = vld [vmem:[%s1451_s3 + $0x20] sm:$0xff]   ;;  %v1074_v60 = vld [vmem:[%s1451_s3 + $0xe8] sm:$0xff]  }
  0x14   :  { %257 = vmatprep.subr.bf16.mxu0 %v1035_v21  ;;  %310 = vmatprep.subr.bf16.mxu1 %v1037_v22  ;;  %v1068_v54 = vld [vmem:[%s1451_s3 + $0x98] sm:$0xff]   ;;  %v1072_v58 = vld [vmem:[%s1451_s3 + $0xa0] sm:$0xff]   ;;  %v1075_v61 = vld [vmem:[%s1451_s3 + $0x28] sm:$0xff]  }
  0x15   :  { %v1076_v62 = vld [vmem:[%s1451_s3 + $0xa8] sm:$0xff]   ;;  %v1077_v63 = vld [vmem:[%s1451_s3 + $0x70] sm:$0xff]   ;;  %v1081_v3 = vld [vmem:[%s1451_s3 + $0x78] sm:$0xff]  }
  0x16   :  { %v1078_v0 = vld [vmem:[%s1451_s3 + $0xf0] sm:$0xff]   ;;  %v1082_v4 = vld [vmem:[%s1451_s3 + $0xf8] sm:$0xff]   ;;  %v65_v11 = vld [vmem:[%s1453_s2] sm:$0xf] }
  0x17   :  { %258 = vmatpush1.bf16.msra.mxu0 %v1039_v23  ;;  %311 = vmatpush1.bf16.msra.mxu1 %v1040_v24  ;;  %v1080_v2 = vld [vmem:[%s1451_s3 + $0xb0] sm:$0xff]   ;;  %v1083_v5 = vld [vmem:[%s1451_s3 + $0x38] sm:$0xff]   ;;  %v70_v14 = vrot.slane %v65_v11, %v69_v9  ;;  %v78_v15 = vrot.slane %v65_v11, %v77_v10  ;;  %v74_v16 = vrot.slane %v65_v11, %v73_v12 }
  0x18   :  { %259 = vmatprep.subr.bf16.mxu0 %v1041_v25  ;;  %312 = vmatprep.subr.bf16.mxu1 %v1043_v26  ;;  %v1084_v6 = vld [vmem:[%s1451_s3 + $0xb8] sm:$0xff]   ;;  %v82_v17 = vrot.slane %v65_v11, %v81_v13 }
  0x1b   :  { %260 = vmatpush1.bf16.msra.mxu0 %v1045_v27  ;;  %313 = vmatpush1.bf16.msra.mxu1 %v1046_v28 }
  0x1c   :  { %261 = vmatprep.subr.bf16.mxu0 %v1047_v29  ;;  %314 = vmatprep.subr.bf16.mxu1 %v1049_v30 }
  0x1f   :  { %262 = vmatpush1.bf16.msra.mxu0 %v1051_v31  ;;  %315 = vmatpush1.bf16.msra.mxu1 %v1052_v32 }
  0x20   :  { %948 = vmatprep.subr.bf16.mxu0 %v1053_v35  ;;  %976 = vmatprep.subr.bf16.mxu1 %v1054_v36 }
  0x22   :  { %280 = vmatmul.mubr.bf16.vlgmr.msra.gmra.mrb[0].mxu0 %v31_v37  ;;  %333 = vmatmul.mubr.bf16.vlgmr.msra.gmra.mrb[0].mxu1 %v31_v37 }
  0x23   :  { %289 = vmatprep.mubr.bf16.mxu0 %v1125_v1  ;;  %342 = vmatprep.mubr.bf16.mxu1 %v1125_v1  ;;  %v1079_v1 = vld [vmem:[%s1451_s3 + $0x30] sm:$0xff]  }
  0x24   :  { %949 = vmatpush3.bf16.msra.mxu0 %v1055_v38  ;;  %977 = vmatpush3.bf16.msra.mxu1 %v1056_v39 }
  0x25   :  { %950 = vmatprep.subr.bf16.mxu0 %v1057_v40  ;;  %978 = vmatprep.subr.bf16.mxu1 %v1058_v41 }
  0x28   :  { %951 = vmatpush3.bf16.msra.mxu0 %v1059_v44  ;;  %979 = vmatpush3.bf16.msra.mxu1 %v1060_v45 }
  0x29   :  { %952 = vmatprep.subr.bf16.mxu0 %v1061_v47  ;;  %980 = vmatprep.subr.bf16.mxu1 %v1062_v48 }
  0x2a   :  { %290 = vmatmul.mubr.bf16.gmra.mrb[4].mxu0 %v32_v46  ;;  %343 = vmatmul.mubr.bf16.gmra.mrb[4].mxu1 %v32_v46 }
  0x2c   :  { %953 = vmatpush3.bf16.msra.mxu0 %v1063_v49  ;;  %981 = vmatpush3.bf16.msra.mxu1 %v1064_v50 }
  0x2d   :  { %954 = vmatprep.subr.bf16.mxu0 %v1065_v51  ;;  %982 = vmatprep.subr.bf16.mxu1 %v1066_v52 }
  0x30   :  { %955 = vmatpush3.bf16.msra.mxu0 %v1067_v53  ;;  %983 = vmatpush3.bf16.msra.mxu1 %v1068_v54 }
  0x31   :  { %956 = vmatprep.subr.bf16.mxu0 %v1069_v55  ;;  %984 = vmatprep.subr.bf16.mxu1 %v1070_v56 }
  0x34   :  { %957 = vmatpush3.bf16.msra.mxu0 %v1071_v57  ;;  %985 = vmatpush3.bf16.msra.mxu1 %v1072_v58 }
  0x35   :  { %958 = vmatprep.subr.bf16.mxu0 %v1073_v59  ;;  %986 = vmatprep.subr.bf16.mxu1 %v1074_v60 }
  0x38   :  { %959 = vmatpush3.bf16.msra.mxu0 %v1075_v61  ;;  %987 = vmatpush3.bf16.msra.mxu1 %v1076_v62 }
  0x39   :  { %960 = vmatprep.subr.bf16.mxu0 %v1077_v63  ;;  %988 = vmatprep.subr.bf16.mxu1 %v1078_v0 }
  0x3c   :  { %961 = vmatpush3.bf16.msra.mxu0 %v1079_v1  ;;  %989 = vmatpush3.bf16.msra.mxu1 %v1080_v2 }
  0x3d   :  { %962 = vmatprep.subr.bf16.mxu0 %v1081_v3  ;;  %990 = vmatprep.subr.bf16.mxu1 %v1082_v4 }
  0x40   :  { %963 = vmatpush3.bf16.msra.mxu0 %v1083_v5  ;;  %991 = vmatpush3.bf16.msra.mxu1 %v1084_v6 }
  0xf5   :  { %v281_v18 = vpop.f32.mrb[0].mxu0  ;;  %v334_v19 = vpop.f32.mrb[0].mxu1 }
  0xf6   :  { %v282_v20 = vadd.f32 %v281_v18, %v70_v14  ;;  %v335_v21 = vadd.f32 %v334_v19, %v78_v15  ;;  %v283_v22 = vpop.f32.mrb[1].mxu0  ;;  %v336_v23 = vpop.f32.mrb[1].mxu1 }
  0xf7   :  { %v284_v24 = vadd.f32 %v283_v22, %v74_v16  ;;  %v337_v25 = vadd.f32 %v336_v23, %v82_v17  ;;  %v285_v26 = vpop.f32.mrb[2].mxu0  ;;  %v338_v27 = vpop.f32.mrb[2].mxu1 }
  0xf8   :  { %v369_v28 = vmul.f32 0.70710677, %v282_v20  ;;  %v371_v29 = vmul.f32 0.70710677, %v335_v21  ;;  %v286_v32 = vadd.f32 %v285_v26, %v70_v14  ;;  %v1389_v35 = vadd.f32 %v338_v27, %v78_v15  ;;  %v287_v36 = vpop.f32.mrb[3].mxu0  ;;  %v340_v37 = vpop.f32.mrb[3].mxu1 }
  0xf9   :  { %v370_v30 = vmul.f32 0.70710677, %v284_v24  ;;  %v372_v31 = vmul.f32 0.70710677, %v337_v25  ;;  %v288_v38 = vadd.f32 %v287_v36, %v74_v16  ;;  %v1391_v39 = vadd.f32 %v340_v37, %v82_v17 }
  0xfa   :  { %1085 = verf.f32 %v369_v28  ;;  %v373_v40 = vmul.f32 0.70710677, %v286_v32  ;;  %v375_v41 = vmul.f32 0.70710677, %v1389_v35  ;;  %v353_v6 = vmul.f32 0.5, %v282_v20 }
  0xfb   :  { %1087 = verf.f32 %v371_v29  ;;  %v374_v44 = vmul.f32 0.70710677, %v288_v38  ;;  %v376_v46 = vmul.f32 0.70710677, %v1391_v39  ;;  %v355_v7 = vmul.f32 0.5, %v335_v21 }
  0xfc   :  { %1089 = verf.f32 %v370_v30  ;;  %v354_v11 = vmul.f32 0.5, %v284_v24  ;;  %v359_v23 = vmul.f32 0.5, %v1389_v35  ;;  %v358_v24 = vmul.f32 0.5, %v288_v38 }
  0xfd   :  { %1091 = verf.f32 %v372_v31  ;;  %v291_v45 = vpop.f32.mrb[4].mxu0  ;;  %v344_v48 = vpop.f32.mrb[4].mxu1 }
  0xfe   :  { %1093 = verf.f32 %v373_v40  ;;  %v1395_v47 = vadd.f32 %v291_v45, %v70_v14  ;;  %v293_v49 = vpop.f32.mrb[5].mxu0  ;;  %v1397_v50 = vadd.f32 %v344_v48, %v78_v15  ;;  %v346_v52 = vpop.f32.mrb[5].mxu1 }
  0xff   :  { %1095 = verf.f32 %v375_v41  ;;  %v1399_v51 = vadd.f32 %v293_v49, %v74_v16  ;;  %v295_v53 = vpop.f32.mrb[6].mxu0  ;;  %v1402_v55 = vadd.f32 %v346_v52, %v82_v17  ;;  %v348_v56 = vpop.f32.mrb[6].mxu1 }
 0x100   :  { %1097 = verf.f32 %v374_v44  ;;  %v377_v54 = vmul.f32 0.70710677, %v1395_v47  ;;  %v297_v57 = vpop.f32.mrb[7].mxu0  ;;  %v379_v58 = vmul.f32 0.70710677, %v1397_v50  ;;  %v350_v59 = vpop.f32.mrb[7].mxu1  ;;  %v296_v62 = vadd.f32 %v295_v53, %v70_v14 }
 0x101   :  { %1099 = verf.f32 %v376_v46  ;;  %v378_v60 = vmul.f32 0.70710677, %v1399_v51  ;;  %v380_v61 = vmul.f32 0.70710677, %v1402_v55  ;;  %v1407_v63 = vadd.f32 %v348_v56, %v78_v15 }
 0x102   :  { %1101 = verf.f32 %v377_v54  ;;  %v1409_v0 = vadd.f32 %v297_v57, %v74_v16  ;;  %v381_v3 = vmul.f32 0.70710677, %v296_v62  ;;  %v1411_v4 = vadd.f32 %v350_v59, %v82_v17 }
 0x103   :  { %1103 = verf.f32 %v379_v58  ;;  %v383_v8 = vmul.f32 0.70710677, %v1407_v63  ;;  %v356_v15 = vmul.f32 0.5, %v337_v25  ;;  %v357_v16 = vmul.f32 0.5, %v286_v32 }
 0x104   :  { %v1086_v1 = vpop.eup %1085  ;;  %1105 = verf.f32 %v378_v60  ;;  %v382_v12 = vmul.f32 0.70710677, %v1409_v0  ;;  %v384_v20 = vmul.f32 0.70710677, %v1411_v4  ;;  %v360_v32 = vmul.f32 0.5, %v1391_v39 }
 0x105   :  { %v1088_v2 = vpop.eup %1087  ;;  %1107 = verf.f32 %v380_v61  ;;  %v401_v10 = vadd.f32 1.0, %v1086_v1  ;;  %v361_v57 = vmul.f32 0.5, %v1395_v47  ;;  %v363_v59 = vmul.f32 0.5, %v1397_v50 }
 0x106   :  { %v1090_v5 = vpop.eup %1089  ;;  %1109 = verf.f32 %v381_v3  ;;  %v403_v14 = vadd.f32 1.0, %v1088_v2  ;;  %v365_v61 = vmul.f32 0.5, %v296_v62  ;;  %v362_v3 = vmul.f32 0.5, %v1399_v51 }
 0x107   :  { %v1092_v9 = vpop.eup %1091  ;;  %1111 = verf.f32 %v383_v8  ;;  %v402_v17 = vadd.f32 1.0, %v1090_v5  ;;  %v417_v28 = vmul.f32 %v401_v10, %v353_v6  ;;  %v367_v5 = vmul.f32 0.5, %v1407_v63 }
 0x108   :  { %v1094_v13 = vpop.eup %1093  ;;  %1113 = verf.f32 %v382_v12  ;;  %v404_v22 = vadd.f32 1.0, %v1092_v9  ;;  %v419_v25 = vmul.f32 %v403_v14, %v355_v7  ;;  %v366_v7 = vmul.f32 0.5, %v1409_v0 }
 0x109   :  { %v1096_v18 = vpop.eup %1095  ;;  %v405_v19 = vadd.f32 1.0, %v1094_v13  ;;  %1115 = verf.f32 %v384_v20  ;;  %v418_v40 = vmul.f32 %v402_v17, %v354_v11  ;;  %v364_v62 = vmul.f32 0.5, %v1402_v55  ;;  %v913_v55 = vld [vmem:[%s1454_s4] ss:$0 sm:$0xff] }
 0x10a   :  { %v1098_v21 = vpop.eup %1097  ;;  %v407_v26 = vadd.f32 1.0, %v1096_v18  ;;  %v420_v46 = vmul.f32 %v404_v22, %v356_v15  ;;  %v368_v13 = vmul.f32 0.5, %v1411_v4 }
 0x10b   :  { %v1100_v27 = vpop.eup %1099  ;;  %v421_v29 = vmul.f32 %v405_v19, %v357_v16  ;;  %v406_v30 = vadd.f32 1.0, %v1098_v21 }
 0x10c   :  { %v423_v31 = vmul.f32 %v407_v26, %v359_v23  ;;  %v408_v36 = vadd.f32 1.0, %v1100_v27  ;;  %v1102_v37 = vpop.eup %1101 }
 0x10d   :  { %v433_v41 = vpack.c.bf16 %v421_v29, %v417_v28  ;;  %v422_v44 = vmul.f32 %v406_v30, %v358_v24  ;;  %v1104_v45 = vpop.eup %1103  ;;  %v409_v53 = vadd.f32 1.0, %v1102_v37 }
 0x10e   :  { %v435_v48 = vpack.c.bf16 %v423_v31, %v419_v25  ;;  %v424_v35 = vmul.f32 %v408_v36, %v360_v32  ;;  %v1106_v49 = vpop.eup %1105  ;;  %v411_v58 = vadd.f32 1.0, %v1104_v45 }
 0x10f   :  { %v434_v38 = vpack.c.bf16 %v422_v44, %v418_v40  ;;  %v1108_v52 = vpop.eup %1107  ;;  %v410_v60 = vadd.f32 1.0, %v1106_v49  ;;  %v425_v47 = vmul.f32 %v409_v53, %v361_v57 }
 0x110   :  { %v436_v54 = vpack.c.bf16 %v424_v35, %v420_v46  ;;  %v1110_v56 = vpop.eup %1109  ;;  %v412_v8 = vadd.f32 1.0, %v1108_v52  ;;  %v427_v50 = vmul.f32 %v411_v58, %v363_v59 }
 0x111   :  { %736 = vmatprep.mubr.bf16.mxu0 %v434_v38  ;;  %v1112_v39 = vpop.eup %1111  ;;  %v413_v1 = vadd.f32 1.0, %v1110_v56  ;;  %v426_v14 = vmul.f32 %v410_v60, %v362_v3 }
 0x112   :  { %785 = vmatprep.mubr.bf16.mxu1 %v436_v54  ;;  %737 = vmatmul.mubr.bf16.vlgmr.msra.gmra.mrb[8].mxu0 %v433_v41  ;;  %v1114_v2 = vpop.eup %1113  ;;  %v415_v6 = vadd.f32 1.0, %v1112_v39  ;;  %v428_v18 = vmul.f32 %v412_v8, %v364_v62 }
 0x113   :  { %786 = vmatmul.mubr.bf16.vlgmr.msra.gmra.mrb[8].mxu1 %v435_v48  ;;  %v429_v9 = vmul.f32 %v413_v1, %v365_v61  ;;  %v414_v10 = vadd.f32 1.0, %v1114_v2  ;;  %v1116_v11 = vpop.eup %1115 }
 0x114   :  { %v431_v12 = vmul.f32 %v415_v6, %v367_v5  ;;  %v416_v51 = vadd.f32 1.0, %v1116_v11 }
 0x115   :  { %v430_v15 = vmul.f32 %v414_v10, %v366_v7  ;;  %v437_v16 = vpack.c.bf16 %v429_v9, %v425_v47 }
 0x116   :  { %v439_v63 = vpack.c.bf16 %v431_v12, %v427_v50  ;;  %v432_v17 = vmul.f32 %v416_v51, %v368_v13 }
 0x117   :  { %v438_v0 = vpack.c.bf16 %v430_v15, %v426_v14 }
 0x118   :  { %v440_v19 = vpack.c.bf16 %v432_v17, %v428_v18 }
 0x119   :  { %744 = vmatprep.mubr.bf16.mxu0 %v438_v0 }
 0x11a   :  { %745 = vmatmul.mubr.bf16.gmra.mrb[12].mxu0 %v437_v16  ;;  %793 = vmatprep.mubr.bf16.mxu1 %v440_v19 }
 0x11b   :  { %794 = vmatmul.mubr.bf16.gmra.mrb[12].mxu1 %v439_v63 }
 0x1e5   :  { %v964_v20 = vpop.f32.mrb[8].mxu0 }
 0x1e6   :  { %v992_v21 = vpop.f32.mrb[8].mxu1  ;;  %v965_v4 = vpop.f32.mrb[9].mxu0 }
 0x1e7   :  { %v966_v22 = vadd.f32 %v965_v4, %v964_v20  ;;  %v993_v23 = vpop.f32.mrb[9].mxu1  ;;  %v967_v26 = vpop.f32.mrb[10].mxu0 }
 0x1e8   :  { %v994_v24 = vadd.f32 %v993_v23, %v992_v21  ;;  %v995_v27 = vpop.f32.mrb[10].mxu1  ;;  %v968_v28 = vpop.f32.mrb[11].mxu0  ;;  %v946_v21 = vld [vmem:[%s1455_s5] ss:$0 sm:$0xff] }
 0x1e9   :  { %v739_v29 = vadd.f32 %v966_v22, %v913_v55  ;;  %v969_v30 = vadd.f32 %v968_v28, %v967_v26  ;;  %v996_v25 = vpop.f32.mrb[11].mxu1  ;;  %v947_v22 = vld [vmem:[%s1456_s6] ss:$0 sm:$0xff] }
 0x1ea   :  { %v997_v31 = vadd.f32 %v996_v25, %v995_v27 }
 0x1eb   :  { %v788_v32 = vadd.f32 %v994_v24, %v739_v29  ;;  %v742_v36 = vadd.f32 %v969_v30, %v913_v55 }
 0x1ed   :  { %v791_v37 = vadd.f32 %v997_v31, %v742_v36  ;;  %v802_v40 = vadd.f32 %v788_v32, %v1267_v33  ;;  %v970_v41 = vpop.f32.mrb[12].mxu0 }
 0x1ee   :  { %v971_v44 = vpop.f32.mrb[13].mxu0  ;;  %v998_v45 = vpop.f32.mrb[12].mxu1 }
 0x1ef   :  { %808 = vadd.xlane.f32.xlu0 %v802_v40  ;;  %v972_v46 = vadd.f32 %v971_v44, %v970_v41  ;;  %v973_v48 = vpop.f32.mrb[14].mxu0  ;;  %v999_v35 = vpop.f32.mrb[13].mxu1  ;;  %v803_v38 = vadd.f32 %v791_v37, %v1272_v34 }
 0x1f0   :  { %v974_v49 = vpop.f32.mrb[15].mxu0  ;;  %v1000_v53 = vadd.f32 %v999_v35, %v998_v45  ;;  %v1001_v54 = vpop.f32.mrb[14].mxu1 }
 0x1f1   :  { %v747_v52 = vadd.f32 %v972_v46, %v913_v55  ;;  %v975_v56 = vadd.f32 %v974_v49, %v973_v48  ;;  %v1002_v57 = vpop.f32.mrb[15].mxu1 }
 0x1f2   :  { %v1003_v59 = vadd.f32 %v1002_v57, %v1001_v54 }
 0x1f3   :  { %810 = vadd.xlane.f32.xlu0 %v803_v38  ;;  %v796_v58 = vadd.f32 %v1000_v53, %v747_v52  ;;  %v750_v39 = vadd.f32 %v975_v56, %v913_v55 }
 0x1f5   :  { %v799_v33 = vadd.f32 %v1003_v59, %v750_v39  ;;  %v804_v60 = vadd.f32 %v796_v58, %v1297_v42 }
 0x1f7   :  { %812 = vadd.xlane.f32.xlu1 %v804_v60  ;;  %v805_v61 = vadd.f32 %v799_v33, %v1302_v43 }
 0x1fb   :  { %814 = vadd.xlane.f32.xlu1 %v805_v61 }
 0x27c   :  { %v809_v1 = vpop.xlane.xlu0 %808 }
 0x27d   :  { %v817_v2 = vmul.f32 0.0078125, %v809_v1 }
 0x27f   :  { %v821_v3 = vsub.f32 %v802_v40, %v817_v2 }
 0x280   :  { %v811_v34 = vpop.xlane.xlu0 %810 }
 0x281   :  { %v818_v5 = vmul.f32 0.0078125, %v811_v34  ;;  %v825_v6 = vmul.f32 %v821_v3, %v821_v3 }
 0x283   :  { %v822_v7 = vsub.f32 %v803_v38, %v818_v5  ;;  %829 = vadd.xlane.f32.xlu0 %v825_v6 }
 0x284   :  { %v813_v47 = vpop.xlane.xlu1 %812 }
 0x285   :  { %v826_v8 = vmul.f32 %v822_v7, %v822_v7  ;;  %v819_v9 = vmul.f32 0.0078125, %v813_v47 }
 0x287   :  { %831 = vadd.xlane.f32.xlu1 %v826_v8  ;;  %v823_v10 = vsub.f32 %v804_v60, %v819_v9 }
 0x288   :  { %v815_v11 = vpop.xlane.xlu1 %814 }
 0x289   :  { %v820_v50 = vmul.f32 0.0078125, %v815_v11  ;;  %v827_v42 = vmul.f32 %v823_v10, %v823_v10 }
 0x28b   :  { %v824_v62 = vsub.f32 %v805_v61, %v820_v50  ;;  %833 = vadd.xlane.f32.xlu0 %v827_v42 }
 0x28d   :  { %v828_v43 = vmul.f32 %v824_v62, %v824_v62 }
 0x28f   :  { %835 = vadd.xlane.f32.xlu1 %v828_v43 }
 0x310   :  { %v830_v12 = vpop.xlane.xlu0 %829 }
 0x311   :  { %v837_v13 = vmul.f32 0.0078125, %v830_v12 }
 0x313   :  { %v841_v14 = vadd.f32 1e-05, %v837_v13 }
 0x314   :  { %v832_v15 = vpop.xlane.xlu1 %831 }
 0x315   :  { %1117 = vrsqrt.f32 %v841_v14  ;;  %v838_v51 = vmul.f32 0.0078125, %v832_v15 }
 0x317   :  { %v842_v16 = vadd.f32 1e-05, %v838_v51 }
 0x318   :  { %v834_v63 = vpop.xlane.xlu0 %833 }
 0x319   :  { %1119 = vrsqrt.f32 %v842_v16  ;;  %v839_v18 = vmul.f32 0.0078125, %v834_v63 }
 0x31b   :  { %v843_v17 = vadd.f32 1e-05, %v839_v18 }
 0x31c   :  { %v836_v0 = vpop.xlane.xlu1 %835 }
 0x31d   :  { %1121 = vrsqrt.f32 %v843_v17  ;;  %v840_v19 = vmul.f32 0.0078125, %v836_v0 }
 0x31f   :  { %v1118_v20 = vpop.eup %1117  ;;  %v844_v4 = vadd.f32 1e-05, %v840_v19 }
 0x320   :  { %v849_v55 = vmul.f32 %v1118_v20, %v821_v3 }
 0x321   :  { %1123 = vrsqrt.f32 %v844_v4 }
 0x322   :  { %v859_v23 = vmul.f32 %v946_v21, %v849_v55 }
 0x323   :  { %v1120_v26 = vpop.eup %1119 }
 0x324   :  { %v869_v24 = vadd.f32 %v947_v22, %v859_v23  ;;  %v850_v27 = vmul.f32 %v1120_v26, %v822_v7 }
 0x326   :  { %873 = vst [vmem:[%s1457_s7] sm:$0xff] %v869_v24  ;;  %v860_v28 = vmul.f32 %v946_v21, %v850_v27 }
 0x327   :  { %v1122_v29 = vpop.eup %1121 }
 0x328   :  { %v870_v30 = vadd.f32 %v947_v22, %v860_v28  ;;  %v851_v25 = vmul.f32 %v1122_v29, %v823_v10 }
 0x32a   :  { %874 = vst [vmem:[%s1457_s7 + $0x8] sm:$0xff] %v870_v30  ;;  %v861_v31 = vmul.f32 %v946_v21, %v851_v25 }
 0x32b   :  { %v1124_v32 = vpop.eup %1123 }
 0x32c   :  { %v871_v36 = vadd.f32 %v947_v22, %v861_v31  ;;  %v852_v37 = vmul.f32 %v1124_v32, %v824_v62 }
 0x32e   :  { %875 = vst [vmem:[%s1457_s7 + $0x10] sm:$0xff] %v871_v36  ;;  %v862_v40 = vmul.f32 %v946_v21, %v852_v37 }
 0x330   :  { %v872_v41 = vadd.f32 %v947_v22, %v862_v40 }
 0x332   :  { %876 = vst [vmem:[%s1457_s7 + $0x18] sm:$0xff] %v872_v41 }

// kernel: gpt1_forward.5
= control target key start
LH: loop header
LB: loop body
LE: loop exit
PB: predicated region body
PF: predicated region fallthrough
CT: control target
= control target key end

     0   :  { %s2719_s24 = smov 0   ;;  %s3154_s0 = inlined_call_operand.vmem [shape: f32[2,16,128], index: 0, kind: input, shape index: {}]   ;;  %s3155_s1 = inlined_call_operand.vmem [shape: bf16[128,384], index: 1, kind: input, shape index: {}]   ;;  %s3156_s2 = inlined_call_operand.vmem [shape: f32[1,384], index: 2, kind: input, shape index: {}]   ;;  %s3157_s3 = inlined_call_operand.vmem [shape: bf16[128,128], index: 3, kind: input, shape index: {}]   ;;  %s3158_s4 = inlined_call_operand.vmem [shape: f32[1,128], index: 4, kind: input, shape index: {}, may-alias: {4,6}]   ;;  %s3159_s5 = inlined_call_operand.vmem [shape: f32[1,128], index: 5, kind: input, shape index: {}]   ;;  %s3160_s6 = inlined_call_operand.vmem [shape: f32[1,128], index: 6, kind: input, shape index: {}, may-alias: {4,6}]   ;;  %s3161_s7 = inlined_call_operand.vmem [shape: f32[2,16,128], index: 7, kind: output, shape index: {}]  }
   0x1 LB: > { %s2360_s25 = sadd.s32 4294967295, %s2669_s24   ;;  %p2364_p0 = scmp.ge.s32.totalorder %s2669_s24, 1  ;;  %s2669_s24 = sphi %s2719_s24, %s17_s24  }
   0x2   : > { %p237_p1 = scmp.lt.s32.totalorder %s2669_s24, 3 }
   0x4   : > { %p238_p2 = pnand %p2364_p0, %p237_p1 }
   0x5   : > { %v2585_v0 = vld [vmem:[%s3155_s1 + $0x4] ss:$12 sps:$4 sm:$0xff] (!%p238_p2)   ;;  %v2587_v1 = vld [vmem:[%s3155_s1] ss:$12 sps:$4 sm:$0xff] (!%p238_p2)   ;;  %v2671_v2 = vmov (!%p238_p2), 0   ;;  %p269_p3 = scmp.lt.s32.totalorder (!%p238_p2), %s2360_s25, 1  ;;  %v317_v23 = vlaneseq (!%p238_p2) }
   0x6   : > { %241 = sbr.rel (%p238_p2) target bundleno = 1867 (0x74b), region = 48  ;;  %492 = vmatprep.mubr.bf16.mxu0 (!%p238_p2), %v2671_v2  ;;  %460 = vmatprep.subr.bf16.mxu0 (!%p238_p2), %v2585_v0  ;;  %v2588_v3 = vld [vmem:[%s3155_s1 + $0x1c] ss:$12 sps:$4 sm:$0xff] (!%p238_p2)   ;;  %v2590_v4 = vld [vmem:[%s3155_s1 + $0x18] ss:$12 sps:$4 sm:$0xff] (!%p238_p2)   ;;  %v2672_v21 = vmov (!%p238_p2), 0.0   ;;  %v2853_v51 = vpack.i.b16 (!%p238_p2), %v2671_v2, %v2671_v2 }
   0x7   : > { %461 = vmatpush1.bf16.msra.mxu0 (!%p238_p2), %v2587_v1  ;;  %v2591_v5 = vld [vmem:[%s3155_s1 + $0x34] ss:$12 sps:$4 sm:$0xff] (!%p238_p2)   ;;  %v2593_v6 = vld [vmem:[%s3155_s1 + $0x30] ss:$12 sps:$4 sm:$0xff] (!%p238_p2)   ;;  %v2594_v7 = vld [vmem:[%s3155_s1 + $0x4c] ss:$12 sps:$4 sm:$0xff] (!%p238_p2)   ;;  %2466 = vmatprep.subr.bf16.mxu1 (!%p238_p2), %v2672_v21 }
   0x8   : > { %462 = vmatprep.subr.bf16.mxu0 (!%p238_p2), %v2588_v3  ;;  %v2596_v8 = vld [vmem:[%s3155_s1 + $0x48] ss:$12 sps:$4 sm:$0xff] (!%p238_p2)   ;;  %v2597_v9 = vld [vmem:[%s3155_s1 + $0x64] ss:$12 sps:$4 sm:$0xff] (!%p238_p2)   ;;  %v2599_v10 = vld [vmem:[%s3155_s1 + $0x60] ss:$12 sps:$4 sm:$0xff] (!%p238_p2)  }
   0x9   : > { %v2600_v11 = vld [vmem:[%s3155_s1 + $0x7c] ss:$12 sps:$4 sm:$0xff] (!%p238_p2)   ;;  %v2602_v12 = vld [vmem:[%s3155_s1 + $0x78] ss:$12 sps:$4 sm:$0xff] (!%p238_p2)   ;;  %v2603_v13 = vld [vmem:[%s3155_s1 + $0x94] ss:$12 sps:$4 sm:$0xff] (!%p238_p2)  }
   0xa   : > { %v2605_v14 = vld [vmem:[%s3155_s1 + $0x90] ss:$12 sps:$4 sm:$0xff] (!%p238_p2)   ;;  %v2606_v15 = vld [vmem:[%s3155_s1 + $0xac] ss:$12 sps:$4 sm:$0xff] (!%p238_p2)   ;;  %v2608_v16 = vld [vmem:[%s3155_s1 + $0xa8] ss:$12 sps:$4 sm:$0xff] (!%p238_p2)  }
   0xb   : > { %463 = vmatpush1.bf16.msra.mxu0 (!%p238_p2), %v2590_v4  ;;  %v2609_v20 = vld [vmem:[%s3155_s1 + $0x8] ss:$12 sps:$4 sm:$0xff] (!%p238_p2)   ;;  %v2610_v22 = vld [vmem:[%s3155_s1 + $0x20] ss:$12 sps:$4 sm:$0xff] (!%p238_p2)   ;;  %v2799_v24 = vshrl.u32 (!%p238_p2), %v317_v23, 7  ;;  %s2673_s8 = smov (!%p238_p2), 32  }
   0xc   : > { %464 = vmatprep.subr.bf16.mxu0 (!%p238_p2), %v2591_v5  ;;  %2467 = vmatpush3.bf16.msra.mxu1 (!%p238_p2), %v2609_v20  ;;  %v2611_v25 = vld [vmem:[%s3155_s1 + $0x38] ss:$12 sps:$4 sm:$0xff] (!%p238_p2)   ;;  %v2808_v27 = vld [vmem:[%s3156_s2] sm:$0x7] (!%p238_p2)  ;;  %v2612_v37 = vld [vmem:[%s3155_s1 + $0x50] ss:$12 sps:$4 sm:$0xff] (!%p238_p2)  }
   0xd   : > { %s3163_s25 = smov (!%p269_p3, %s2360_s25), 1  ;;  %2468 = vmatprep.subr.bf16.mxu1 %v2672_v21  ;;  %v319_v26 = vsub.s32 0, %v2799_v24  ;;  %v323_v28 = vsub.s32 1, %v2799_v24  ;;  %s2674_s9 = smov 96   ;;  %v2613_v42 = vld [vmem:[%s3155_s1 + $0x68] ss:$12 sps:$4 sm:$0xff]  }
   0xe   : > { %s2430_s17 = sshll.u32 %s3163_s25, 4  ;;  %s2675_s12 = smov 64   ;;  %v2614_v43 = vld [vmem:[%s3155_s1 + $0x80] ss:$12 sps:$4 sm:$0xff]   ;;  %v2615_v44 = vld [vmem:[%s3155_s1 + $0x98] ss:$12 sps:$4 sm:$0xff]  }
   0xf   : > { %465 = vmatpush1.bf16.msra.mxu0 %v2593_v6  ;;  %s2781_s15 = scalar_lea.vmem %s3154_s0, %s2430_s17  ;;  %v320_v29 = vrot.slane %v2808_v27, %v319_v26  ;;  %v324_v31 = vrot.slane %v2808_v27, %v323_v28  ;;  %v2616_v45 = vld [vmem:[%s3155_s1 + $0xb0] ss:$12 sps:$4 sm:$0xff]   ;;  %vm2676_vm0 = vmmov 0   ;;  %v2677_v46 = vmov 1983009808   ;;  %s278_s27 = scalar_lea.vmem %s3161_s7, %s2430_s17 }
  0x10   : > { %466 = vmatprep.subr.bf16.mxu0 %v2594_v7  ;;  %v280_v17 = vld [vmem:[%s2781_s15] sm:$0xff]  ;;  %v281_v18 = vld [vmem:[%s2781_s15 + $0x8] sm:$0xff]  ;;  %2469 = vmatpush3.bf16.msra.mxu1 %v2610_v22  ;;  %v578_v47 = vunpack.c.l.s4 %v2677_v46  ;;  %v2678_v49 = vmov 1934713408   ;;  %vm1358_vm1 = vcmask 261120   ;;  %vm1574_vm3 = vcmask 130048  }
  0x11   : > { %v282_v19 = vpack.c.bf16 %v281_v18, %v280_v17  ;;  %2470 = vmatprep.subr.bf16.mxu1 %v2672_v21  ;;  %2482 = vmatprep.mubr.msk.bf16.mxu1 %vm2676_vm0, %v2672_v21  ;;  %v609_v50 = vunpack.c.l.s4 %v2678_v49  ;;  %vm2141_vm5 = vcmask 523264   ;;  %vm2144_vm6 = vcmask 785408  }
  0x12   : > { %v579_v48 = vunpack.c.0.s8 %v578_v47 }
  0x13   : > { %467 = vmatpush1.bf16.msra.mxu0 %v2596_v8  ;;  %v610_v58 = vunpack.c.0.s8 %v609_v50 }
  0x14   : > { %468 = vmatprep.subr.bf16.mxu0 %v2597_v9  ;;  %2471 = vmatpush3.bf16.msra.mxu1 %v2611_v25  ;;  %v2856_v57 = vsub.s32 %v579_v48, %v2799_v24 }
  0x15   : > { %2472 = vmatprep.subr.bf16.mxu1 %v2672_v21  ;;  %v2861_v3 = vsub.s32 %v610_v58, %v2799_v24 }
  0x17   : > { %469 = vmatpush1.bf16.msra.mxu0 %v2599_v10 }
  0x18   : > { %470 = vmatprep.subr.bf16.mxu0 %v2600_v11  ;;  %2473 = vmatpush3.bf16.msra.mxu1 %v2612_v37 }
  0x19   : > { %2474 = vmatprep.subr.bf16.mxu1 %v2672_v21 }
  0x1b   : > { %471 = vmatpush1.bf16.msra.mxu0 %v2602_v12 }
  0x1c   : > { %472 = vmatprep.subr.bf16.mxu0 %v2603_v13  ;;  %2475 = vmatpush3.bf16.msra.mxu1 %v2613_v42 }
  0x1d   : > { %2476 = vmatprep.subr.bf16.mxu1 %v2672_v21 }
  0x1f   : > { %473 = vmatpush1.bf16.msra.mxu0 %v2605_v14 }
  0x20   : > { %474 = vmatprep.subr.bf16.mxu0 %v2606_v15  ;;  %2477 = vmatpush3.bf16.msra.mxu1 %v2614_v43 }
  0x21   : > { %2478 = vmatprep.subr.bf16.mxu1 %v2672_v21 }
  0x23   : > { %475 = vmatpush1.bf16.msra.mxu0 %v2608_v16 }
  0x24   : > { %2510 = vmatprep.subr.bf16.mxu0 %v2672_v21  ;;  %2479 = vmatpush3.bf16.msra.mxu1 %v2615_v44 }
  0x25   : > { %2480 = vmatprep.subr.bf16.mxu1 %v2672_v21 }
  0x26   : > { %493 = vmatmul.mubr.bf16.vlgmr.msra.gmra.mrb[0].mxu0 %v282_v19 }
  0x27   : > { %2512 = vmatprep.mubr.msk.bf16.mxu0 %vm2676_vm0, %v2672_v21 }
  0x28   : > { %2481 = vmatpush3.bf16.msra.mxu1 %v2616_v45 }
  0x29   : > { %2486 = vmatprep.subr.bf16.mxu1 %v2672_v21 }
  0x2b   : > { %2483 = vmatmul.mubr.bf16.vlgmr.msra.gmra.mrb[0].mxu1 %v282_v19 }
  0x2c   : > { %2488 = vmatprep.mubr.msk.bf16.mxu1 %vm2676_vm0, %v2672_v21 }
  0xf9   : > { %v494_v30 = vpop.f32.mrb[0].mxu0 }
  0xfa   : > { %v496_v32 = vpop.f32.mrb[1].mxu0  ;;  %v495_v34 = vadd.f32 %v494_v30, %v320_v29 }
  0xfb   : > { %v498_v33 = vpop.f32.mrb[2].mxu0  ;;  %v497_v38 = vadd.f32 %v496_v32, %v324_v31 }
  0xfc   : > { %v499_v35 = vadd.f32 %v498_v33, %v320_v29  ;;  %v500_v36 = vpop.f32.mrb[3].mxu0 }
  0xfd   : > { %v501_v39 = vadd.f32 %v500_v36, %v324_v31 }
  0xfe   : > { %v2817_v40 = vpack.c.bf16 %v499_v35, %v495_v34 }
  0xff   : > { %v545_v41 = vpack.c.bf16 %v501_v39, %v497_v38 }
 0x100   : > { %v558_v9 = vshrl.u32 %v2817_v40, 16 }
 0x101   : > { %825 = vrot.lane.b32.xlu1 %v545_v41, %s2673_s8  ;;  %821 = vrot.lane.b32.xlu0 %v545_v41, %s2674_s9  ;;  %v831_v55 = vshrl.u32 %v545_v41, 16 }
 0x105   : > { %823 = vrot.lane.b32.xlu0 %v545_v41, %s2675_s12  ;;  %548 = vrot.lane.b32.xlu1 %v2817_v40, %s2674_s9 }
 0x109   : > { %550 = vrot.lane.b32.xlu0 %v2817_v40, %s2675_s12  ;;  %552 = vrot.lane.b32.xlu1 %v2817_v40, %s2673_s8 }
 0x173   : > { %v826_v52 = vpop.permute.xlu1 %825  ;;  %v822_v53 = vpop.permute.xlu0 %821 }
 0x174   : > { %v829_v54 = vpack.i.b16 %v822_v53, %v545_v41  ;;  %v832_v56 = vshrl.u32 %v822_v53, 16  ;;  %v840_v0 = vshrl.u32 %v826_v52, 16 }
 0x176   : > { %v833_v59 = vpack.i.b16 %v832_v56, %v831_v55  ;;  %v843_v60 = vcombine.high %v829_v54, %v2853_v51  ;;  %v850_v4 = vrot.slane %v829_v54, %v2856_v57 }
 0x177   : > { %v824_v61 = vpop.permute.xlu0 %823  ;;  %v549_v63 = vpop.permute.xlu1 %548 }
 0x178   : > { %v837_v62 = vpack.i.b16 %v826_v52, %v824_v61  ;;  %v909_v1 = vcombine.high %v833_v59, %v2853_v51  ;;  %v839_v2 = vshrl.u32 %v824_v61, 16  ;;  %v857_v7 = vrot.slane %v843_v60, %v2856_v57 }
 0x179   : > { %v559_v10 = vshrl.u32 %v549_v63, 16  ;;  %v916_v11 = vrot.slane %v833_v59, %v2856_v57  ;;  %v556_v18 = vpack.i.b16 %v549_v63, %v2817_v40 }
 0x17a   : > { %v858_v5 = vcombine.high %v837_v62, %v2853_v51  ;;  %v865_v6 = vrot.slane %v837_v62, %v2856_v57  ;;  %v841_v8 = vpack.i.b16 %v840_v0, %v839_v2  ;;  %v923_v15 = vrot.slane %v909_v1, %v2856_v57 }
 0x17b   : > { %v560_v30 = vpack.i.b16 %v559_v10, %v558_v9  ;;  %v551_v31 = vpop.permute.xlu0 %550  ;;  %v553_v40 = vpop.permute.xlu1 %552  ;;  %v576_v44 = vcombine.high %v556_v18, %v2853_v51  ;;  %v583_v45 = vrot.slane %v556_v18, %v2856_v57 }
 0x17c   : > { %v872_v12 = vrot.slane %v858_v5, %v2856_v57  ;;  %v873_v13 = vcombine.low %v850_v4, %v865_v6  ;;  %v874_v14 = vcombine.high %v850_v4, %v865_v6  ;;  %v924_v16 = vcombine.high %v841_v8, %v2853_v51 }
 0x17d   : > { %v931_v17 = vrot.slane %v841_v8, %v2856_v57  ;;  %v566_v43 = vshrl.u32 %v551_v31, 16  ;;  %v642_v46 = vcombine.high %v560_v30, %v2853_v51  ;;  %v564_v49 = vpack.i.b16 %v553_v40, %v551_v31 }
 0x17e   : > { %v881_v19 = vrot.slane %v873_v13, %v2861_v3  ;;  %v888_v20 = vrot.slane %v874_v14, %v2861_v3  ;;  %v889_v22 = vcombine.low %v857_v7, %v872_v12  ;;  %v890_v25 = vcombine.high %v857_v7, %v872_v12 }
 0x17f   : > { %v938_v26 = vrot.slane %v924_v16, %v2856_v57  ;;  %v939_v28 = vcombine.low %v916_v11, %v931_v17  ;;  %v940_v29 = vcombine.high %v916_v11, %v931_v17  ;;  %v567_v50 = vshrl.u32 %v553_v40, 16 }
 0x180   : > { %v897_v32 = vrot.slane %v889_v22, %v2861_v3  ;;  %v904_v33 = vrot.slane %v890_v25, %v2861_v3  ;;  %v975_v34 = vcombine.low %v881_v19, %v888_v20  ;;  %v2397_v35 = vcombine.high %v881_v19, %v888_v20 }
 0x181   : > { %v947_v36 = vrot.slane %v939_v28, %v2861_v3  ;;  %v954_v37 = vrot.slane %v940_v29, %v2861_v3  ;;  %v955_v38 = vcombine.low %v923_v15, %v938_v26  ;;  %v956_v39 = vcombine.high %v923_v15, %v938_v26 }
 0x182   : > { %v991_v41 = vcombine.low %v897_v32, %v904_v33  ;;  %v2398_v42 = vcombine.high %v897_v32, %v904_v33  ;;  %v982_v47 = vrot.slane %v975_v34, %v2856_v57  ;;  %v990_v48 = vrot.slane %v2397_v35, %v2856_v57 }
 0x183   : > { %v963_v52 = vrot.slane %v955_v38, %v2861_v3  ;;  %v970_v53 = vrot.slane %v956_v39, %v2861_v3  ;;  %v1025_v54 = vcombine.low %v947_v36, %v954_v37  ;;  %v568_v56 = vpack.i.b16 %v567_v50, %v566_v43 }
 0x184   : > { %v998_v55 = vrot.slane %v991_v41, %v2856_v57  ;;  %v591_v58 = vcombine.high %v564_v49, %v2853_v51  ;;  %v598_v59 = vrot.slane %v564_v49, %v2856_v57  ;;  %v1006_v60 = vrot.slane %v2398_v42, %v2856_v57 }
 0x185   : > { %v2399_v61 = vcombine.high %v947_v36, %v954_v37  ;;  %v590_v62 = vrot.slane %v576_v44, %v2856_v57  ;;  %v649_v63 = vrot.slane %v560_v30, %v2856_v57  ;;  %v656_v0 = vrot.slane %v642_v46, %v2856_v57 }
 0x186   : > { %v605_v1 = vrot.slane %v591_v58, %v2856_v57  ;;  %v606_v2 = vcombine.low %v583_v45, %v598_v59  ;;  %v607_v4 = vcombine.high %v583_v45, %v598_v59  ;;  %v657_v5 = vcombine.high %v568_v56, %v2853_v51 }
 0x187   : > { %v1041_v6 = vcombine.low %v963_v52, %v970_v53  ;;  %v2400_v7 = vcombine.high %v963_v52, %v970_v53  ;;  %v664_v8 = vrot.slane %v568_v56, %v2856_v57  ;;  %v1007_v9 = vcombine.low %v982_v47, %v990_v48 }
 0x188   : > { %v622_v10 = vcombine.low %v590_v62, %v605_v1  ;;  %v623_v11 = vcombine.high %v590_v62, %v605_v1  ;;  %v1015_v12 = vcombine.low %v998_v55, %v1006_v60  ;;  %v1032_v13 = vrot.slane %v1025_v54, %v2856_v57 }
 0x189   : > { %v671_v14 = vrot.slane %v657_v5, %v2856_v57  ;;  %v672_v15 = vcombine.low %v649_v63, %v664_v8  ;;  %v673_v16 = vcombine.high %v649_v63, %v664_v8  ;;  %v1040_v17 = vrot.slane %v2399_v61, %v2856_v57 }
 0x18a   : > { %v614_v18 = vrot.slane %v606_v2, %v2861_v3  ;;  %v621_v19 = vrot.slane %v607_v4, %v2861_v3  ;;  %v630_v20 = vrot.slane %v622_v10, %v2861_v3  ;;  %v637_v22 = vrot.slane %v623_v11, %v2861_v3 }
 0x18b   : > { %v680_v25 = vrot.slane %v672_v15, %v2861_v3  ;;  %v687_v26 = vrot.slane %v673_v16, %v2861_v3  ;;  %v688_v28 = vcombine.low %v656_v0, %v671_v14  ;;  %v689_v29 = vcombine.high %v656_v0, %v671_v14 }
 0x18c   : > { %v724_v30 = vcombine.low %v630_v20, %v637_v22  ;;  %v2394_v31 = vcombine.high %v630_v20, %v637_v22  ;;  %v1048_v32 = vrot.slane %v1041_v6, %v2856_v57  ;;  %v1056_v33 = vrot.slane %v2400_v7, %v2856_v57 }
 0x18d   : > { %v696_v34 = vrot.slane %v688_v28, %v2861_v3  ;;  %v703_v35 = vrot.slane %v689_v29, %v2861_v3  ;;  %v758_v36 = vcombine.low %v680_v25, %v687_v26  ;;  %v2395_v37 = vcombine.high %v680_v25, %v687_v26 }
 0x18e   : > { %v708_v38 = vcombine.low %v614_v18, %v621_v19  ;;  %v2393_v39 = vcombine.high %v614_v18, %v621_v19  ;;  %v1057_v40 = vcombine.low %v1032_v13, %v1040_v17  ;;  %v731_v41 = vrot.slane %v724_v30, %v2856_v57 }
 0x18f   : > { %v774_v42 = vcombine.low %v696_v34, %v703_v35  ;;  %v2396_v43 = vcombine.high %v696_v34, %v703_v35  ;;  %v1022_v44 = vrot.slane %v1015_v12, %v2861_v3  ;;  %v739_v45 = vrot.slane %v2394_v31, %v2856_v57 }
 0x190   : > { %v765_v46 = vrot.slane %v758_v36, %v2856_v57  ;;  %v773_v47 = vrot.slane %v2395_v37, %v2856_v57  ;;  %v1065_v48 = vcombine.low %v1048_v32, %v1056_v33  ;;  %v1014_v52 = vrot.slane %v1007_v9, %v2861_v3  ;;  %v537_v37 = vpop.f32.mrb[0].mxu1 }
 0x191   : > { %v781_v49 = vrot.slane %v774_v42, %v2856_v57  ;;  %v789_v50 = vrot.slane %v2396_v43, %v2856_v57  ;;  %v715_v53 = vrot.slane %v708_v38, %v2856_v57  ;;  %v723_v54 = vrot.slane %v2393_v39, %v2856_v57  ;;  %v2484_v39 = vpop.f32.mrb[1].mxu1 }
 0x192   : > { %v1064_v55 = vrot.slane %v1057_v40, %v2861_v3  ;;  %v1072_v56 = vrot.slane %v1065_v48, %v2861_v3  ;;  %v748_v59 = vcombine.low %v731_v41, %v739_v45  ;;  %v790_v60 = vcombine.low %v765_v46, %v773_v47  ;;  %v540_v40 = vpop.f32.mrb[2].mxu1 }
 0x193   : > { %v798_v58 = vcombine.low %v781_v49, %v789_v50  ;;  %v1023_v61 = vcombine.low %v1014_v52, %v1022_v44  ;;  %v740_v63 = vcombine.low %v715_v53, %v723_v54  ;;  %v1024_v16 = vcombine.high %v1014_v52, %v1022_v44  ;;  %v2485_v42 = vpop.f32.mrb[3].mxu1 }
 0x194   : > { %v1073_v62 = vcombine.low %v1064_v55, %v1072_v56  ;;  %v755_v4 = vrot.slane %v748_v59, %v2861_v3  ;;  %v797_v5 = vrot.slane %v790_v60, %v2861_v3  ;;  %v1074_v14 = vcombine.high %v1064_v55, %v1072_v56 }
 0x195   : > { %v805_v1 = vrot.slane %v798_v58, %v2861_v3  ;;  %v747_v7 = vrot.slane %v740_v63, %v2861_v3  ;;  %v1078_v9 = vshrl.u32 %v1023_v61, 16  ;;  %v1084_v26 = vshrl.u32 %v1024_v16, 16 }
 0x196   : > { %v1077_v0 = vpack.i.b16 %v1073_v62, %v1023_v61  ;;  %v1079_v6 = vshrl.u32 %v1073_v62, 16  ;;  %v1083_v18 = vpack.i.b16 %v1074_v14, %v1024_v16  ;;  %v1085_v22 = vshrl.u32 %v1074_v14, 16 }
 0x197   : > { %v806_v8 = vcombine.low %v797_v5, %v805_v1  ;;  %v756_v10 = vcombine.low %v747_v7, %v755_v4  ;;  %v807_v25 = vcombine.high %v797_v5, %v805_v1  ;;  %v757_v28 = vcombine.high %v747_v7, %v755_v4 }
 0x198   : > { %v1363_v2 = vsel %vm1358_vm1, %v1077_v0, 0  ;;  %v1080_v11 = vpack.i.b16 %v1079_v6, %v1078_v9  ;;  %v1457_v20 = vsel %vm1358_vm1, %v1083_v18, 0  ;;  %v1086_v29 = vpack.i.b16 %v1085_v22, %v1084_v26 }
 0x199   : > { %2487 = vmatpush3.bf16.xpose.msra.mxu1 %v1363_v2  ;;  %v810_v12 = vpack.i.b16 %v806_v8, %v756_v10  ;;  %v812_v15 = vshrl.u32 %v806_v8, 16  ;;  %v811_v17 = vshrl.u32 %v756_v10, 16  ;;  %v816_v30 = vpack.i.b16 %v807_v25, %v757_v28 }
 0x19a   : > { %2492 = vmatprep.subr.bf16.mxu1 %v2672_v21  ;;  %v1410_v13 = vsel %vm1358_vm1, %v1080_v11, 0  ;;  %v1504_v31 = vsel %vm1358_vm1, %v1086_v29, 0  ;;  %v818_v32 = vshrl.u32 %v807_v25, 16  ;;  %v817_v33 = vshrl.u32 %v757_v28, 16 }
 0x19b   : > { %v813_v19 = vpack.i.b16 %v812_v15, %v811_v17  ;;  %v327_v35 = vsub.s32 2, %v2799_v24  ;;  %v1559_v44 = vand.u32 127, %v317_v23  ;;  %v1557_v45 = vadd.s32 8, %v2799_v24 }
 0x19c   : > { %v819_v34 = vpack.i.b16 %v818_v32, %v817_v33 }
 0x19d   : > { %v328_v36 = vrot.slane %v2808_v27, %v327_v35  ;;  %vm1560_vm2 = vcmp.le.s32.totalorder %v1559_v44, %v2799_v24  ;;  %vm1561_vm4 = vcmp.le.s32.totalorder %v1559_v44, %v1557_v45 }
 0x19f   : > { %v538_v38 = vadd.f32 %v537_v37, %v328_v36  ;;  %v541_v41 = vadd.f32 %v540_v40, %v328_v36 }
 0x1a0   : > { %2489 = vmatmul.mubr.msk.bf16.vlgmr.msra.gmra.mrb[4].mxu1 %vm1358_vm1, %v810_v12 }
 0x1a1   : > { %2493 = vmatpush3.bf16.xpose.msra.mxu1 %v1410_v13  ;;  %2494 = vmatprep.mubr.msk.bf16.mxu1 %vm2676_vm0, %v2672_v21  ;;  %v2949_v43 = vpack.c.bf16 %v541_v41, %v538_v38 }
 0x1a2   : > { %2498 = vmatprep.subr.bf16.mxu1 %v2672_v21 }
 0x1a8   : > { %2495 = vmatmul.mubr.msk.bf16.vlgmr.msra.gmra.mrb[8].mxu1 %vm1358_vm1, %v813_v19 }
 0x1a9   : > { %2499 = vmatpush3.bf16.xpose.msra.mxu1 %v1457_v20  ;;  %2500 = vmatprep.mubr.msk.bf16.mxu1 %vm2676_vm0, %v2672_v21 }
 0x1aa   : > { %2504 = vmatprep.subr.bf16.mxu1 %v2672_v21 }
 0x1b0   : > { %2501 = vmatmul.mubr.msk.bf16.vlgmr.msra.gmra.mrb[12].mxu1 %vm1358_vm1, %v816_v30 }
 0x1b1   : > { %2505 = vmatpush3.bf16.xpose.msra.mxu1 %v1504_v31  ;;  %2506 = vmatprep.mubr.msk.bf16.mxu1 %vm2676_vm0, %v2672_v21 }
 0x1b2   : > { %2516 = vmatprep.subr.bf16.mxu1 %v2672_v21 }
 0x1b8   : > { %2507 = vmatmul.mubr.msk.bf16.vlgmr.msra.gmra.mrb[16].mxu1 %vm1358_vm1, %v819_v34 }
 0x1b9   : > { %2518 = vmatprep.mubr.msk.bf16.mxu1 %vm2676_vm0, %v2672_v21 }
 0x273   : > { %v1399_v46 = vpop.f32.mrb[4].mxu1 }
 0x274   : > { %v1547_v47 = vmul.f32 0.17677669, %v1399_v46  ;;  %v2490_v48 = vpop.f32.mrb[5].mxu1 }
 0x275   : > { %v1402_v49 = vpop.f32.mrb[6].mxu1 }
 0x276   : > { %v1548_v27 = vmul.f32 0.17677669, %v1402_v49  ;;  %v2491_v50 = vpop.f32.mrb[7].mxu1  ;;  %v1566_v52 = vsel %vm1560_vm2, %v1547_v47, -1e+30 }
 0x277   : > { %v1575_v53 = vsel %vm1574_vm3, %v1566_v52, -inf }
 0x278   : > { %1576 = vmax.xlane.f32.xlu0 %v1575_v53  ;;  %v1567_v23 = vsel %vm1561_vm4, %v1548_v27, -1e+30 }
 0x279   : > { %v1578_v54 = vsel %vm1574_vm3, %v1567_v23, -inf }
 0x27a   : > { %1579 = vmax.xlane.f32.xlu1 %v1578_v54 }
 0x27b   : > { %v1446_v55 = vpop.f32.mrb[8].mxu1 }
 0x27c   : > { %v1549_v56 = vmul.f32 0.17677669, %v1446_v55  ;;  %v2496_v58 = vpop.f32.mrb[9].mxu1 }
 0x27d   : > { %v1449_v59 = vpop.f32.mrb[10].mxu1 }
 0x27e   : > { %v1550_v60 = vmul.f32 0.17677669, %v1449_v59  ;;  %v2497_v61 = vpop.f32.mrb[11].mxu1  ;;  %v1568_v62 = vsel %vm1560_vm2, %v1549_v56, -1e+30  ;;  %v1098_v56 = vshrl.u32 %v2949_v43, 16 }
 0x27f   : > { %v1581_v63 = vsel %vm1574_vm3, %v1568_v62, -inf }
 0x280   : > { %1582 = vmax.xlane.f32.xlu0 %v1581_v63  ;;  %v1569_v0 = vsel %vm1561_vm4, %v1550_v60, -1e+30 }
 0x281   : > { %v1584_v2 = vsel %vm1574_vm3, %v1569_v0, -inf }
 0x283   : > { %v1493_v1 = vpop.f32.mrb[12].mxu1 }
 0x284   : > { %v1551_v4 = vmul.f32 0.17677669, %v1493_v1  ;;  %1585 = vmax.xlane.f32.xlu0 %v1584_v2  ;;  %v2502_v5 = vpop.f32.mrb[13].mxu1 }
 0x285   : > { %v1496_v6 = vpop.f32.mrb[14].mxu1 }
 0x286   : > { %v1552_v7 = vmul.f32 0.17677669, %v1496_v6  ;;  %v2503_v8 = vpop.f32.mrb[15].mxu1  ;;  %v1570_v9 = vsel %vm1560_vm2, %v1551_v4, -1e+30 }
 0x287   : > { %v1587_v10 = vsel %vm1574_vm3, %v1570_v9, -inf }
 0x288   : > { %1588 = vmax.xlane.f32.xlu1 %v1587_v10  ;;  %v1571_v11 = vsel %vm1561_vm4, %v1552_v7, -1e+30 }
 0x289   : > { %v1590_v12 = vsel %vm1574_vm3, %v1571_v11, -inf }
 0x28a   : > { %1591 = vmax.xlane.f32.xlu0 %v1590_v12 }
 0x28b   : > { %v1540_v13 = vpop.f32.mrb[16].mxu1 }
 0x28c   : > { %v1553_v14 = vmul.f32 0.17677669, %v1540_v13  ;;  %v2508_v15 = vpop.f32.mrb[17].mxu1 }
 0x28d   : > { %v1543_v16 = vpop.f32.mrb[18].mxu1 }
 0x28e   : > { %v1554_v17 = vmul.f32 0.17677669, %v1543_v16  ;;  %v2509_v18 = vpop.f32.mrb[19].mxu1  ;;  %v1572_v19 = vsel %vm1560_vm2, %v1553_v14, -1e+30 }
 0x28f   : > { %v1593_v20 = vsel %vm1574_vm3, %v1572_v19, -inf }
 0x290   : > { %1594 = vmax.xlane.f32.xlu1 %v1593_v20  ;;  %v1573_v22 = vsel %vm1561_vm4, %v1554_v17, -1e+30 }
 0x291   : > { %v1596_v25 = vsel %vm1574_vm3, %v1573_v22, -inf }
 0x292   : > { %1597 = vmax.xlane.f32.xlu0 %v1596_v25 }
 0x2a1   : > { %1088 = vrot.lane.b32.xlu1 %v2949_v43, %s2674_s9 }
 0x2a5   : > { %1092 = vrot.lane.b32.xlu1 %v2949_v43, %s2673_s8 }
 0x2a8   : > { %1090 = vrot.lane.b32.xlu0 %v2949_v43, %s2675_s12 }
 0x305   : > { %v1577_v26 = vpop.xlane.xlu0 %1576 }
 0x306   : > { %v1599_v24 = vsub.f32 %v1566_v52, %v1577_v26 }
 0x307   : > { %v1580_v28 = vpop.xlane.xlu1 %1579 }
 0x308   : > { %v1607_v29 = vmul.f32 1.442695, %v1599_v24  ;;  %v1600_v30 = vsub.f32 %v1567_v23, %v1580_v28 }
 0x30a   : > { %2625 = vpow2.f32 %v1607_v29  ;;  %v1609_v31 = vmul.f32 1.442695, %v1600_v30 }
 0x30c   : > { %2627 = vpow2.f32 %v1609_v31 }
 0x30d   : > { %v1583_v32 = vpop.xlane.xlu0 %1582 }
 0x30e   : > { %v1601_v33 = vsub.f32 %v1568_v62, %v1583_v32 }
 0x310   : > { %v1611_v34 = vmul.f32 1.442695, %v1601_v33 }
 0x311   : > { %v1586_v35 = vpop.xlane.xlu0 %1585 }
 0x312   : > { %2629 = vpow2.f32 %v1611_v34  ;;  %v1602_v36 = vsub.f32 %v1569_v0, %v1586_v35 }
 0x314   : > { %v2980_v37 = vpop.eup %2625  ;;  %v1613_v38 = vmul.f32 1.442695, %v1602_v36 }
 0x315   : > { %v1589_v39 = vpop.xlane.xlu1 %1588  ;;  %v1623_v40 = vsel %vm1574_vm3, %v2980_v37, 0.0 }
 0x316   : > { %v2984_v41 = vpop.eup %2627  ;;  %2631 = vpow2.f32 %v1613_v38  ;;  %v1603_v42 = vsub.f32 %v1570_v9, %v1589_v39  ;;  %1624 = vadd.xlane.f32.xlu1 %v1623_v40 }
 0x317   : > { %v1592_v44 = vpop.xlane.xlu0 %1591  ;;  %v1626_v45 = vsel %vm1574_vm3, %v2984_v41, 0.0 }
 0x318   : > { %v1615_v46 = vmul.f32 1.442695, %v1603_v42  ;;  %v1604_v47 = vsub.f32 %v1571_v11, %v1592_v44  ;;  %1627 = vadd.xlane.f32.xlu0 %v1626_v45 }
 0x31a   : > { %2633 = vpow2.f32 %v1615_v46  ;;  %v1617_v48 = vmul.f32 1.442695, %v1604_v47 }
 0x31c   : > { %v2988_v49 = vpop.eup %2629  ;;  %2635 = vpow2.f32 %v1617_v48 }
 0x31d   : > { %v1595_v27 = vpop.xlane.xlu1 %1594  ;;  %v1629_v50 = vsel %vm1574_vm3, %v2988_v49, 0.0 }
 0x31e   : > { %v1605_v52 = vsub.f32 %v1572_v19, %v1595_v27  ;;  %1630 = vadd.xlane.f32.xlu0 %v1629_v50 }
 0x31f   : > { %v1598_v53 = vpop.xlane.xlu0 %1597 }
 0x320   : > { %v2992_v23 = vpop.eup %2631  ;;  %v1619_v54 = vmul.f32 1.442695, %v1605_v52  ;;  %v1606_v55 = vsub.f32 %v1573_v22, %v1598_v53 }
 0x321   : > { %v1089_v58 = vpop.permute.xlu1 %1088  ;;  %v1632_v59 = vsel %vm1574_vm3, %v2992_v23, 0.0 }
 0x322   : > { %2637 = vpow2.f32 %v1619_v54  ;;  %v1621_v60 = vmul.f32 1.442695, %v1606_v55  ;;  %v1096_v61 = vpack.i.b16 %v1089_v58, %v2949_v43  ;;  %v1099_v62 = vshrl.u32 %v1089_v58, 16  ;;  %1633 = vadd.xlane.f32.xlu1 %v1632_v59 }
 0x323   : > { %v1091_v1 = vpop.permute.xlu0 %1090 }
 0x324   : > { %v2998_v63 = vpop.eup %2633  ;;  %v1100_v0 = vpack.i.b16 %v1099_v62, %v1098_v56  ;;  %2639 = vpow2.f32 %v1621_v60  ;;  %v1110_v6 = vcombine.high %v1096_v61, %v2853_v51  ;;  %v1106_v43 = vshrl.u32 %v1091_v1, 16 }
 0x325   : > { %v1093_v2 = vpop.permute.xlu1 %1092  ;;  %v1635_v4 = vsel %vm1574_vm3, %v2998_v63, 0.0  ;;  %v1117_v11 = vrot.slane %v1096_v61, %v2856_v57 }
 0x326   : > { %v3002_v5 = vpop.eup %2635  ;;  %v1104_v7 = vpack.i.b16 %v1093_v2, %v1091_v1  ;;  %1636 = vadd.xlane.f32.xlu0 %v1635_v4  ;;  %v1176_v8 = vcombine.high %v1100_v0, %v2853_v51  ;;  %v1107_v9 = vshrl.u32 %v1093_v2, 16  ;;  %v1124_v15 = vrot.slane %v1110_v6, %v2856_v57 }
 0x327   : > { %v1638_v10 = vsel %vm1574_vm3, %v3002_v5, 0.0  ;;  %v1183_v19 = vrot.slane %v1100_v0, %v2856_v57 }
 0x328   : > { %v1125_v12 = vcombine.high %v1104_v7, %v2853_v51  ;;  %v1132_v13 = vrot.slane %v1104_v7, %v2856_v57  ;;  %1639 = vadd.xlane.f32.xlu1 %v1638_v10  ;;  %v1108_v14 = vpack.i.b16 %v1107_v9, %v1106_v43  ;;  %v1190_v20 = vrot.slane %v1176_v8, %v2856_v57 }
 0x32a   : > { %v1139_v16 = vrot.slane %v1125_v12, %v2856_v57  ;;  %v1140_v17 = vcombine.low %v1117_v11, %v1132_v13  ;;  %v1141_v18 = vcombine.high %v1117_v11, %v1132_v13  ;;  %v1191_v22 = vcombine.high %v1108_v14, %v2853_v51 }
 0x32b   : > { %v1198_v25 = vrot.slane %v1108_v14, %v2856_v57 }
 0x32c   : > { %v3017_v26 = vpop.eup %2637  ;;  %v1148_v24 = vrot.slane %v1140_v17, %v2861_v3  ;;  %v1155_v28 = vrot.slane %v1141_v18, %v2861_v3  ;;  %v1156_v29 = vcombine.low %v1124_v15, %v1139_v16  ;;  %v1157_v30 = vcombine.high %v1124_v15, %v1139_v16 }
 0x32d   : > { %v1205_v31 = vrot.slane %v1191_v22, %v2856_v57  ;;  %v1206_v32 = vcombine.low %v1183_v19, %v1198_v25  ;;  %v1207_v33 = vcombine.high %v1183_v19, %v1198_v25  ;;  %v1641_v34 = vsel %vm1574_vm3, %v3017_v26, 0.0 }
 0x32e   : > { %v1164_v35 = vrot.slane %v1156_v29, %v2861_v3  ;;  %v1171_v51 = vrot.slane %v1157_v30, %v2861_v3  ;;  %v1242_v36 = vcombine.low %v1148_v24, %v1155_v28  ;;  %v2401_v38 = vcombine.high %v1148_v24, %v1155_v28  ;;  %1642 = vadd.xlane.f32.xlu0 %v1641_v34  ;;  %v3026_v39 = vpop.eup %2639 }
 0x32f   : > { %v1214_v40 = vrot.slane %v1206_v32, %v2861_v3  ;;  %v1221_v42 = vrot.slane %v1207_v33, %v2861_v3  ;;  %v1222_v44 = vcombine.low %v1190_v20, %v1205_v31  ;;  %v1223_v45 = vcombine.high %v1190_v20, %v1205_v31 }
 0x330   : > { %v1249_v46 = vrot.slane %v1242_v36, %v2856_v57  ;;  %v1257_v47 = vrot.slane %v2401_v38, %v2856_v57  ;;  %v1258_v48 = vcombine.low %v1164_v35, %v1171_v51  ;;  %v2402_v27 = vcombine.high %v1164_v35, %v1171_v51 }
 0x331   : > { %v1230_v50 = vrot.slane %v1222_v44, %v2861_v3  ;;  %v1237_v52 = vrot.slane %v1223_v45, %v2861_v3  ;;  %v1292_v53 = vcombine.low %v1214_v40, %v1221_v42  ;;  %v2403_v54 = vcombine.high %v1214_v40, %v1221_v42 }
 0x332   : > { %v1265_v55 = vrot.slane %v1258_v48, %v2856_v57  ;;  %v1273_v56 = vrot.slane %v2402_v27, %v2856_v57  ;;  %v1644_v58 = vsel %vm1574_vm3, %v3026_v39, 0.0  ;;  %v1274_v59 = vcombine.low %v1249_v46, %v1257_v47 }
 0x333   : > { %v1299_v60 = vrot.slane %v1292_v53, %v2856_v57  ;;  %v1307_v61 = vrot.slane %v2403_v54, %v2856_v57  ;;  %v1308_v62 = vcombine.low %v1230_v50, %v1237_v52  ;;  %v2404_v0 = vcombine.high %v1230_v50, %v1237_v52  ;;  %1645 = vadd.xlane.f32.xlu1 %v1644_v58 }
 0x334   : > { %v1282_v1 = vcombine.low %v1265_v55, %v1273_v56  ;;  %v1281_v7 = vrot.slane %v1274_v59, %v2861_v3  ;;  %v2621_v55 = vld [vmem:[%s3157_s3 + $0x20] sm:$0xff]   ;;  %v2622_v56 = vld [vmem:[%s3157_s3 + $0x28] sm:$0xff]  }
 0x335   : > { %v1315_v2 = vrot.slane %v1308_v62, %v2856_v57  ;;  %v1323_v4 = vrot.slane %v2404_v0, %v2856_v57  ;;  %v1324_v6 = vcombine.low %v1299_v60, %v1307_v61 }
 0x336   : > { %v1289_v8 = vrot.slane %v1282_v1, %v2861_v3 }
 0x337   : > { %v1332_v43 = vcombine.low %v1315_v2, %v1323_v4  ;;  %v1331_v11 = vrot.slane %v1324_v6, %v2861_v3 }
 0x338   : > { %v1290_v9 = vcombine.low %v1281_v7, %v1289_v8  ;;  %v1291_v10 = vcombine.high %v1281_v7, %v1289_v8 }
 0x339   : > { %v1339_v12 = vrot.slane %v1332_v43, %v2861_v3 }
 0x33a   : > { %v1346_v15 = vshrl.u32 %v1290_v9, 16  ;;  %v1354_v16 = vshrl.u32 %v1291_v10, 16 }
 0x33b   : > { %v1340_v13 = vcombine.low %v1331_v11, %v1339_v12  ;;  %v1341_v14 = vcombine.high %v1331_v11, %v1339_v12 }
 0x33d   : > { %v1344_v17 = vpack.i.b16 %v1340_v13, %v1290_v9  ;;  %v1347_v18 = vshrl.u32 %v1340_v13, 16  ;;  %v1352_v19 = vpack.i.b16 %v1341_v14, %v1291_v10  ;;  %v1355_v20 = vshrl.u32 %v1341_v14, 16 }
 0x33f   : > { %2511 = vmatpush3.bf16.msra.mxu0 %v1344_v17  ;;  %v1348_v22 = vpack.i.b16 %v1347_v18, %v1346_v15  ;;  %v1356_v25 = vpack.i.b16 %v1355_v20, %v1354_v16 }
 0x340   : > { %2522 = vmatprep.subr.bf16.mxu0 %v2672_v21 }
 0x341   : > { %2517 = vmatpush3.bf16.msra.mxu1 %v1348_v22 }
 0x342   : > { %2528 = vmatprep.subr.bf16.mxu1 %v2672_v21 }
 0x3a3   : > { %v1625_v24 = vpop.xlane.xlu1 %1624 }
 0x3a4   : > { %2641 = vrcp.f32 %v1625_v24 }
 0x3a5   : > { %v1628_v28 = vpop.xlane.xlu0 %1627 }
 0x3a6   : > { %2643 = vrcp.f32 %v1628_v28 }
 0x3ab   : > { %v1631_v29 = vpop.xlane.xlu0 %1630 }
 0x3ac   : > { %2645 = vrcp.f32 %v1631_v29 }
 0x3ae   : > { %v2642_v30 = vpop.eup %2641 }
 0x3af   : > { %v1634_v31 = vpop.xlane.xlu1 %1633  ;;  %v1655_v33 = vmul.f32 %v2642_v30, %v2980_v37 }
 0x3b0   : > { %v2644_v32 = vpop.eup %2643  ;;  %2647 = vrcp.f32 %v1634_v31 }
 0x3b1   : > { %v1656_v34 = vmul.f32 %v2644_v32, %v2984_v41 }
 0x3b3   : > { %v1637_v35 = vpop.xlane.xlu0 %1636  ;;  %v1663_v51 = vpack.c.bf16 %v1656_v34, %v1655_v33 }
 0x3b4   : > { %2649 = vrcp.f32 %v1637_v35 }
 0x3b5   : > { %v1640_v36 = vpop.xlane.xlu1 %1639  ;;  %2513 = vmatmul.mubr.msk.bf16.vlgmr.msra.gmra.mrb[4].mxu0 %vm1574_vm3, %v1663_v51 }
 0x3b6   : > { %2651 = vrcp.f32 %v1640_v36  ;;  %2523 = vmatpush3.bf16.msra.mxu0 %v1352_v19  ;;  %2524 = vmatprep.mubr.msk.bf16.mxu0 %vm2676_vm0, %v2672_v21  ;;  %v2646_v38 = vpop.eup %2645 }
 0x3b7   : > { %2534 = vmatprep.subr.bf16.mxu0 %v2672_v21  ;;  %v1657_v42 = vmul.f32 %v2646_v38, %v2988_v49 }
 0x3ba   : > { %v2648_v40 = vpop.eup %2647 }
 0x3bb   : > { %v1658_v37 = vmul.f32 %v2648_v40, %v2992_v23  ;;  %v1643_v41 = vpop.xlane.xlu0 %1642 }
 0x3bc   : > { %2653 = vrcp.f32 %v1643_v41 }
 0x3bd   : > { %v1664_v44 = vpack.c.bf16 %v1658_v37, %v1657_v42 }
 0x3be   : > { %v2650_v45 = vpop.eup %2649 }
 0x3bf   : > { %2519 = vmatmul.mubr.msk.bf16.vlgmr.msra.gmra.mrb[20].mxu1 %vm1574_vm3, %v1664_v44  ;;  %v1659_v48 = vmul.f32 %v2650_v45, %v2998_v63  ;;  %v2617_v63 = vld [vmem:[%s3157_s3] sm:$0xff]  }
 0x3c0   : > { %v2652_v46 = vpop.eup %2651  ;;  %v1646_v47 = vpop.xlane.xlu1 %1645  ;;  %2529 = vmatpush3.bf16.msra.mxu1 %v1356_v25  ;;  %2530 = vmatprep.mubr.msk.bf16.mxu1 %vm2676_vm0, %v2672_v21 }
 0x3c1   : > { %v1660_v27 = vmul.f32 %v2652_v46, %v3002_v5  ;;  %2655 = vrcp.f32 %v1646_v47  ;;  %v2618_v5 = vld [vmem:[%s3157_s3 + $0x8] sm:$0xff]  }
 0x3c3   : > { %v1665_v49 = vpack.c.bf16 %v1660_v27, %v1659_v48 }
 0x3c5   : > { %2525 = vmatmul.mubr.msk.bf16.vlgmr.msra.gmra.mrb[8].mxu0 %vm1574_vm3, %v1665_v49 }
 0x3c6   : > { %2550 = vmatprep.mubr.msk.bf16.mxu0 %vm2676_vm0, %v2672_v21  ;;  %v2654_v23 = vpop.eup %2653  ;;  %2535 = vmatpush3.bf16.msra.mxu0 %v2617_v63 }
 0x3c7   : > { %v1661_v52 = vmul.f32 %v2654_v23, %v3017_v26  ;;  %2536 = vmatprep.subr.bf16.mxu0 %v2672_v21  ;;  %v2619_v26 = vld [vmem:[%s3157_s3 + $0x10] sm:$0xff]  }
 0x3ca   : > { %2537 = vmatpush3.bf16.msra.mxu0 %v2618_v5  ;;  %v2623_v5 = vld [vmem:[%s3157_s3 + $0x30] sm:$0xff]  }
 0x3cb   : > { %v2656_v50 = vpop.eup %2655  ;;  %2538 = vmatprep.subr.bf16.mxu0 %v2672_v21 }
 0x3cc   : > { %v1662_v53 = vmul.f32 %v2656_v50, %v3026_v39  ;;  %v2620_v39 = vld [vmem:[%s3157_s3 + $0x18] sm:$0xff]  }
 0x3ce   : > { %v1666_v54 = vpack.c.bf16 %v1662_v53, %v1661_v52  ;;  %2539 = vmatpush3.bf16.msra.mxu0 %v2619_v26 }
 0x3cf   : > { %2540 = vmatprep.subr.bf16.mxu0 %v2672_v21 }
 0x3d0   : > { %2531 = vmatmul.mubr.msk.bf16.vlgmr.msra.gmra.mrb[24].mxu1 %vm1574_vm3, %v1666_v54 }
 0x3d2   : > { %2541 = vmatpush3.bf16.msra.mxu0 %v2620_v39 }
 0x3d3   : > { %2542 = vmatprep.subr.bf16.mxu0 %v2672_v21 }
 0x3d6   : > { %2543 = vmatpush3.bf16.msra.mxu0 %v2621_v55 }
 0x3d7   : > { %2544 = vmatprep.subr.bf16.mxu0 %v2672_v21 }
 0x3da   : > { %2545 = vmatpush3.bf16.msra.mxu0 %v2622_v56 }
 0x3db   : > { %2546 = vmatprep.subr.bf16.mxu0 %v2672_v21 }
 0x3de   : > { %2547 = vmatpush3.bf16.msra.mxu0 %v2623_v5 }
 0x3df   : > { %2548 = vmatprep.subr.bf16.mxu0 %v2672_v21 }
 0x488   : > { %v1704_v58 = vpop.f32.mrb[4].mxu0 }
 0x489   : > { %v2514_v59 = vpop.f32.mrb[5].mxu0 }
 0x48a   : > { %v1707_v60 = vpop.f32.mrb[6].mxu0 }
 0x48b   : > { %v2515_v61 = vpop.f32.mrb[7].mxu0 }
 0x492   : > { %v1748_v62 = vpop.f32.mrb[20].mxu1 }
 0x493   : > { %v2520_v0 = vpop.f32.mrb[21].mxu1 }
 0x494   : > { %v1751_v1 = vpop.f32.mrb[22].mxu1 }
 0x495   : > { %v2521_v2 = vpop.f32.mrb[23].mxu1 }
 0x498   : > { %v1792_v4 = vpop.f32.mrb[8].mxu0 }
 0x499   : > { %v1843_v6 = vcombine.low %v1704_v58, %v1792_v4  ;;  %v1844_v7 = vcombine.high %v1704_v58, %v1792_v4  ;;  %v2526_v8 = vpop.f32.mrb[9].mxu0 }
 0x49a   : > { %v1795_v43 = vpop.f32.mrb[10].mxu0 }
 0x49b   : > { %v1911_v9 = vcombine.low %v1707_v60, %v1795_v43  ;;  %v1912_v10 = vcombine.high %v1707_v60, %v1795_v43  ;;  %v2527_v11 = vpop.f32.mrb[11].mxu0  ;;  %v1851_v16 = vrot.slane %v1843_v6, %v2856_v57  ;;  %v1858_v17 = vrot.slane %v1844_v7, %v2856_v57  ;;  %v2624_v43 = vld [vmem:[%s3157_s3 + $0x38] sm:$0xff]  }
 0x49c   : > { %2549 = vmatpush3.bf16.msra.mxu0 %v2624_v43  ;;  %v2427_v43 = vld [vmem:[%s3160_s6] ss:$0 sm:$0xff] }
 0x49d   : > { %v1919_v32 = vrot.slane %v1911_v9, %v2856_v57  ;;  %v1926_v33 = vrot.slane %v1912_v10, %v2856_v57 }
 0x4a3   : > { %v1836_v12 = vpop.f32.mrb[24].mxu1 }
 0x4a4   : > { %v1859_v13 = vcombine.low %v1748_v62, %v1836_v12  ;;  %v1860_v14 = vcombine.high %v1748_v62, %v1836_v12  ;;  %v2532_v15 = vpop.f32.mrb[25].mxu1 }
 0x4a5   : > { %v1839_v18 = vpop.f32.mrb[26].mxu1 }
 0x4a6   : > { %v1867_v19 = vrot.slane %v1859_v13, %v2856_v57  ;;  %v1874_v20 = vrot.slane %v1860_v14, %v2856_v57  ;;  %v1927_v22 = vcombine.low %v1751_v1, %v1839_v18  ;;  %v1928_v25 = vcombine.high %v1751_v1, %v1839_v18  ;;  %v2533_v24 = vpop.f32.mrb[27].mxu1 }
 0x4a8   : > { %v1875_v28 = vcombine.low %v1851_v16, %v1867_v19  ;;  %v1876_v29 = vcombine.high %v1851_v16, %v1867_v19  ;;  %v1891_v30 = vcombine.low %v1858_v17, %v1874_v20  ;;  %v1892_v31 = vcombine.high %v1858_v17, %v1874_v20 }
 0x4a9   : > { %v1935_v34 = vrot.slane %v1927_v22, %v2856_v57  ;;  %v1942_v35 = vrot.slane %v1928_v25, %v2856_v57 }
 0x4aa   : > { %v1883_v51 = vrot.slane %v1875_v28, %v2861_v3  ;;  %v1890_v36 = vrot.slane %v1876_v29, %v2861_v3  ;;  %v1899_v38 = vrot.slane %v1891_v30, %v2861_v3  ;;  %v1906_v40 = vrot.slane %v1892_v31, %v2861_v3 }
 0x4ab   : > { %v1943_v42 = vcombine.low %v1919_v32, %v1935_v34  ;;  %v1944_v37 = vcombine.high %v1919_v32, %v1935_v34  ;;  %v1959_v41 = vcombine.low %v1926_v33, %v1942_v35  ;;  %v1960_v44 = vcombine.high %v1926_v33, %v1942_v35 }
 0x4ac   : > { %v1979_v45 = vcombine.low %v1883_v51, %v1890_v36  ;;  %v2413_v46 = vcombine.high %v1883_v51, %v1890_v36  ;;  %v1995_v47 = vcombine.low %v1899_v38, %v1906_v40  ;;  %v2414_v48 = vcombine.high %v1899_v38, %v1906_v40 }
 0x4ad   : > { %v1951_v27 = vrot.slane %v1943_v42, %v2861_v3  ;;  %v1958_v49 = vrot.slane %v1944_v37, %v2861_v3  ;;  %v1967_v23 = vrot.slane %v1959_v41, %v2861_v3  ;;  %v1974_v50 = vrot.slane %v1960_v44, %v2861_v3 }
 0x4ae   : > { %v1986_v52 = vrot.slane %v1979_v45, %v2856_v57  ;;  %v1994_v53 = vrot.slane %v2413_v46, %v2856_v57  ;;  %v2002_v54 = vrot.slane %v1995_v47, %v2856_v57  ;;  %v2010_v63 = vrot.slane %v2414_v48, %v2856_v57  ;;  %v2417_v46 = vld [vmem:[%s3158_s4] ss:$0 sm:$0xff] }
 0x4af   : > { %v2047_v26 = vcombine.low %v1951_v27, %v1958_v49  ;;  %v2415_v39 = vcombine.high %v1951_v27, %v1958_v49  ;;  %v2063_v55 = vcombine.low %v1967_v23, %v1974_v50  ;;  %v2416_v56 = vcombine.high %v1967_v23, %v1974_v50 }
 0x4b0   : > { %v2012_v58 = vcombine.high %v1986_v52, %v1994_v53  ;;  %v2028_v59 = vcombine.high %v2002_v54, %v2010_v63  ;;  %v2011_v60 = vcombine.low %v1986_v52, %v1994_v53  ;;  %v2027_v61 = vcombine.low %v2002_v54, %v2010_v63  ;;  %v2661_v52 = vld [vmem:[%s2781_s15] sm:$0xff]  ;;  %v2662_v54 = vld [vmem:[%s2781_s15 + $0x8] sm:$0xff] }
 0x4b1   : > { %v2054_v62 = vrot.slane %v2047_v26, %v2856_v57  ;;  %v2062_v0 = vrot.slane %v2415_v39, %v2856_v57  ;;  %v2070_v1 = vrot.slane %v2063_v55, %v2856_v57  ;;  %v2078_v2 = vrot.slane %v2416_v56, %v2856_v57 }
 0x4b2   : > { %v2026_v4 = vrot.slane %v2012_v58, %v2861_v3  ;;  %v2042_v6 = vrot.slane %v2028_v59, %v2861_v3  ;;  %v2019_v7 = vrot.slane %v2011_v60, %v2861_v3  ;;  %v2035_v8 = vrot.slane %v2027_v61, %v2861_v3 }
 0x4b3   : > { %v2080_v9 = vcombine.high %v2054_v62, %v2062_v0  ;;  %v2096_v10 = vcombine.high %v2070_v1, %v2078_v2  ;;  %v2079_v11 = vcombine.low %v2054_v62, %v2062_v0  ;;  %v2095_v12 = vcombine.low %v2070_v1, %v2078_v2 }
 0x4b4   : > { %v2045_v13 = vcombine.low %v2026_v4, %v2042_v6  ;;  %v2043_v57 = vcombine.low %v2019_v7, %v2035_v8  ;;  %v2044_v14 = vcombine.high %v2019_v7, %v2035_v8  ;;  %v2046_v21 = vcombine.high %v2026_v4, %v2042_v6  ;;  %v2426_v7 = vld [vmem:[%s3159_s5] ss:$0 sm:$0xff] }
 0x4b5   : > { %v2094_v15 = vrot.slane %v2080_v9, %v2861_v3  ;;  %v2110_v16 = vrot.slane %v2096_v10, %v2861_v3  ;;  %v2087_v17 = vrot.slane %v2079_v11, %v2861_v3  ;;  %v2103_v18 = vrot.slane %v2095_v12, %v2861_v3 }
 0x4b7   : > { %v2113_v19 = vcombine.low %v2094_v15, %v2110_v16  ;;  %v2112_v20 = vcombine.high %v2087_v17, %v2103_v18  ;;  %v2111_v22 = vcombine.low %v2087_v17, %v2103_v18  ;;  %v2114_v25 = vcombine.high %v2094_v15, %v2110_v16 }
 0x4b9   : > { %v2575_v24 = vpack.i.bf16 %v2113_v19, %v2045_v13  ;;  %v2570_v28 = vpack.i.bf16 %v2112_v20, %v2044_v14  ;;  %v2580_v29 = vpack.i.bf16 %v2114_v25, %v2046_v21 }
 0x4bb   : > { %2576 = vrot.lane.b32.xlu1 %v2575_v24, %s2675_s12  ;;  %2571 = vrot.lane.b32.xlu0 %v2570_v28, %s2673_s8 }
 0x4bf   : > { %2581 = vrot.lane.b32.xlu1 %v2580_v29, %s2674_s9 }
 0x52d   : > { %v2577_v30 = vpop.permute.xlu1 %2576  ;;  %v2572_v31 = vpop.permute.xlu0 %2571 }
 0x52e   : > { %v2574_v32 = vunpack.i.h.bf16 %v2572_v31  ;;  %v2573_v33 = vunpack.i.l.bf16 %v2572_v31  ;;  %v2579_v34 = vunpack.i.h.bf16 %v2577_v30  ;;  %v2578_v35 = vunpack.i.l.bf16 %v2577_v30 }
 0x530   : > { %v2139_v3 = vsel %vm1358_vm1, %v2043_v57, %v2573_v33  ;;  %v2140_v51 = vsel %vm1358_vm1, %v2111_v22, %v2574_v32 }
 0x531   : > { %v2582_v36 = vpop.permute.xlu1 %2581  ;;  %v2142_v42 = vsel %vm2141_vm5, %v2139_v3, %v2578_v35  ;;  %v2143_v37 = vsel %vm2141_vm5, %v2140_v51, %v2579_v34 }
 0x532   : > { %v2584_v38 = vunpack.i.h.bf16 %v2582_v36  ;;  %v2583_v40 = vunpack.i.l.bf16 %v2582_v36 }
 0x534   : > { %v2145_v41 = vsel %vm2144_vm6, %v2142_v42, %v2583_v40  ;;  %v2146_v44 = vsel %vm2144_vm6, %v2143_v37, %v2584_v38 }
 0x535   : > { %v2147_v45 = vpack.c.bf16 %v2146_v44, %v2145_v41 }
 0x537   : > { %2551 = vmatmul.mubr.bf16.vlgmr.msra.gmra.mrb[12].mxu0 %v2147_v45 }
 0x60a   : > { %v2253_v47 = vpop.f32.mrb[12].mxu0 }
 0x60b   : > { %v2254_v48 = vadd.f32 %v2417_v46, %v2253_v47  ;;  %v2552_v27 = vpop.f32.mrb[13].mxu0 }
 0x60c   : > { %v2256_v49 = vpop.f32.mrb[14].mxu0 }
 0x60d   : > { %v2257_v23 = vadd.f32 %v2417_v46, %v2256_v49  ;;  %v2553_v50 = vpop.f32.mrb[15].mxu0  ;;  %v2260_v53 = vadd.f32 %v2661_v52, %v2254_v48 }
 0x60f   : > { %2264 = vadd.xlane.f32.xlu0 %v2260_v53  ;;  %v2261_v63 = vadd.f32 %v2662_v54, %v2257_v23 }
 0x611   : > { %2266 = vadd.xlane.f32.xlu1 %v2261_v63 }
 0x69c   : > { %v2265_v5 = vpop.xlane.xlu0 %2264 }
 0x69d   : > { %v2269_v26 = vmul.f32 0.0078125, %v2265_v5 }
 0x69e   : > { %v2267_v39 = vpop.xlane.xlu1 %2266 }
 0x69f   : > { %v2271_v55 = vsub.f32 %v2260_v53, %v2269_v26  ;;  %v2270_v56 = vmul.f32 0.0078125, %v2267_v39 }
 0x6a1   : > { %v2272_v58 = vsub.f32 %v2261_v63, %v2270_v56  ;;  %v2273_v59 = vmul.f32 %v2271_v55, %v2271_v55 }
 0x6a3   : > { %2275 = vadd.xlane.f32.xlu0 %v2273_v59  ;;  %v2274_v60 = vmul.f32 %v2272_v58, %v2272_v58 }
 0x6a7   : > { %2277 = vadd.xlane.f32.xlu0 %v2274_v60 }
 0x730   : > { %v2276_v61 = vpop.xlane.xlu0 %2275 }
 0x731   : > { %v2279_v62 = vmul.f32 0.0078125, %v2276_v61 }
 0x733   : > { %v2281_v0 = vadd.f32 1e-05, %v2279_v62 }
 0x734   : > { %v2278_v1 = vpop.xlane.xlu0 %2277 }
 0x735   : > { %2657 = vrsqrt.f32 %v2281_v0  ;;  %v2280_v2 = vmul.f32 0.0078125, %v2278_v1 }
 0x737   : > { %v2282_v4 = vadd.f32 1e-05, %v2280_v2 }
 0x739   : > { %2659 = vrsqrt.f32 %v2282_v4 }
 0x73f   : > { %v2658_v6 = vpop.eup %2657 }
 0x740   : > { %v2285_v8 = vmul.f32 %v2658_v6, %v2271_v55 }
 0x742   : > { %v2293_v9 = vmul.f32 %v2426_v7, %v2285_v8 }
 0x743   : > { %v2660_v10 = vpop.eup %2659 }
 0x744   : > { %v2301_v11 = vadd.f32 %v2427_v43, %v2293_v9  ;;  %v2286_v12 = vmul.f32 %v2660_v10, %v2272_v58 }
 0x746   : > { %2303 = vst [vmem:[%s278_s27] sm:$0xff] %v2301_v11  ;;  %v2294_v13 = vmul.f32 %v2426_v7, %v2286_v12 }
 0x748   : > { %v2302_v57 = vadd.f32 %v2427_v43, %v2294_v13 }
 0x74a   : > { %2304 = vst [vmem:[%s278_s27 + $0x8] sm:$0xff] %v2302_v57 }
 0x74b PF: > { %s17_s24 = sadd.s32 1, %s2669_s24  }
 0x74c   : > { %p14_p4 = scmp.ge.s32.totalorder %s17_s24, 4  }
 0x74e   :  { %16 = sbr.rel (!%p14_p4) target bundleno = 1 (0x1), region = 78 }

</bundles_post_ra>
